<compile_context>
chip_gen: v7x
topology: tpu7x:2x2x1
jax: 0.10.0
libtpu: 0.0.40
codegen_flags: <defaults>
</compile_context>

<pallas_src>
import functools
import math

import jax
import jax.numpy as jnp
from jax.experimental import pallas as pl
from jax.experimental.pallas import tpu as pltpu

# Set to jnp.bfloat16 on v6e/v7x for ~4x MXU throughput (accumulation stays f32).
# Kept at None (= run matmuls in the input dtype, f32) to match PyTorch numerics.
MATMUL_DTYPE = None


# ---------------------------------------------------------------------------
# Tiling helper
# ---------------------------------------------------------------------------

def _pick_tile(dim, candidates):
    """Largest candidate that evenly divides `dim`; else the full dim (valid block)."""
    for c in candidates:
        if dim >= c and dim % c == 0:
            return c
    return dim


# ---------------------------------------------------------------------------
# Pallas kernels
# ---------------------------------------------------------------------------

def _dense_kernel(x_ref, w_ref, b_ref, o_ref, acc_ref, *, activation, matmul_dtype):
    """Tiled o = act(x @ w + b).  Blocks: x(tm,tk) w(tk,tn) b(1,tn) o(tm,tn)."""
    @pl.when(pl.program_id(2) == 0)
    def _init():
        acc_ref[...] = jnp.zeros_like(acc_ref)

    x = x_ref[...]
    w = w_ref[...]
    if matmul_dtype is not None:
        x = x.astype(matmul_dtype)
        w = w.astype(matmul_dtype)
    acc_ref[...] += jnp.dot(x, w, preferred_element_type=jnp.float32)

    @pl.when(pl.program_id(2) == pl.num_programs(2) - 1)
    def _finalize():
        acc = acc_ref[...] + b_ref[...].astype(jnp.float32)
        if activation == "relu":
            acc = jnp.maximum(acc, 0.0)
        o_ref[...] = acc.astype(o_ref.dtype)


def _add_layernorm_kernel(x_ref, y_ref, g_ref, b_ref, o_ref, *, eps):
    """Fused residual + LayerNorm: o = LN(x + y).  x,y,o:(tm,D)  g,b:(1,D)."""
    x = x_ref[...].astype(jnp.float32) + y_ref[...].astype(jnp.float32)
    mu = jnp.mean(x, axis=-1, keepdims=True)
    xc = x - mu
    var = jnp.mean(xc * xc, axis=-1, keepdims=True)
    y = xc * jax.lax.rsqrt(var + eps)
    o_ref[...] = (y * g_ref[...] + b_ref[...]).astype(o_ref.dtype)


def _mha_core(q2d, k2d, v2d, mask, nhead, scale):
    """Scaled dot-product attention over all heads of one batch.

    q2d:(Sq,D) k2d,v2d:(Sk,D) mask:(Sq,Sk) additive or None.
    Returns a lane-dense (Sq, D) f32 result (heads concatenated along lanes).
    """
    d_model = q2d.shape[1]
    dh = d_model // nhead
    outs = []
    for h in range(nhead):
        lo, hi = h * dh, (h + 1) * dh
        qh = q2d[:, lo:hi]
        kh = k2d[:, lo:hi]
        vh = v2d[:, lo:hi]
        # (Sq,Dh) x (Sk,Dh) contracted on Dh -> (Sq,Sk); avoids in-kernel transpose.
        s = jax.lax.dot_general(qh, kh, (((1,), (1,)), ((), ())),
                                preferred_element_type=jnp.float32) * scale
        if mask is not None:
            s = s + mask
        s = s - jnp.max(s, axis=-1, keepdims=True)
        p = jnp.exp(s)
        p = p * pl.reciprocal(jnp.sum(p, axis=-1, keepdims=True), approx=True)
        outs.append(jnp.dot(p.astype(vh.dtype), vh,
                            preferred_element_type=jnp.float32))
    return jnp.concatenate(outs, axis=-1)  # (Sq, D)


def _self_attn_kernel(*refs, nhead, scale, d_model, has_mask):
    """Self-attention from a fused QKV slab.  qkv:(1,S,3D) [mask:(S,S)] o:(1,S,D)."""
    if has_mask:
        qkv_ref, m_ref, o_ref = refs
        mask = m_ref[...]
    else:
        qkv_ref, o_ref = refs
        mask = None
    x = qkv_ref[0]                                   # (S, 3D)
    q = x[:, :d_model]
    k = x[:, d_model:2 * d_model]
    v = x[:, 2 * d_model:3 * d_model]
    o = _mha_core(q, k, v, mask, nhead, scale)
    o_ref[0] = o.astype(o_ref.dtype)                 # single lane-dense store


def _cross_attn_kernel(q_ref, kv_ref, o_ref, *, nhead, scale, d_model):
    """Cross-attention: q:(1,Sq,D) kv:(1,Sk,2D) o:(1,Sq,D) — no mask."""
    q = q_ref[0]
    kv = kv_ref[0]
    k = kv[:, :d_model]
    v = kv[:, d_model:2 * d_model]
    o = _mha_core(q, k, v, None, nhead, scale)
    o_ref[0] = o.astype(o_ref.dtype)


# ---------------------------------------------------------------------------
# Pallas wrappers
# ---------------------------------------------------------------------------

def pallas_dense(x2d, w, b, activation=None):
    """x2d:(M,K) @ w:(K,N) + b:(1,N) -> (M,N).  Tiled / pipelined matmul."""
    M, K = x2d.shape
    Kw, N = w.shape
    assert K == Kw and b.shape == (1, N)
    tm = _pick_tile(M, (256, 128))
    tn = _pick_tile(N, (256, 128))
    tk = _pick_tile(K, (512, 256, 128))
    grid = (M // tm, N // tn, K // tk)
    return pl.pallas_call(
        functools.partial(_dense_kernel, activation=activation,
                          matmul_dtype=MATMUL_DTYPE),
        out_shape=jax.ShapeDtypeStruct((M, N), x2d.dtype),
        grid=grid,
        in_specs=[
            pl.BlockSpec((tm, tk), lambda i, j, k: (i, k)),
            pl.BlockSpec((tk, tn), lambda i, j, k: (k, j)),
            pl.BlockSpec((1, tn), lambda i, j, k: (0, j)),
        ],
        out_specs=pl.BlockSpec((tm, tn), lambda i, j, k: (i, j)),
        scratch_shapes=[pltpu.VMEM((tm, tn), jnp.float32)],
        compiler_params=pltpu.CompilerParams(
            dimension_semantics=("parallel", "parallel", "arbitrary")),
    )(x2d, w, b)


def add_layer_norm(x, y, gamma, beta, eps=1e-5):
    """LN(x + y) over the last axis.  x,y:(B,S,D)  gamma,beta:(1,D)."""
    B, S, D = x.shape
    M = B * S
    tm = _pick_tile(M, (512, 256, 128))
    out = pl.pallas_call(
        functools.partial(_add_layernorm_kernel, eps=eps),
        out_shape=jax.ShapeDtypeStruct((M, D), x.dtype),
        grid=(M // tm,),
        in_specs=[
            pl.BlockSpec((tm, D), lambda i: (i, 0)),
            pl.BlockSpec((tm, D), lambda i: (i, 0)),
            pl.BlockSpec((1, D), lambda i: (0, 0)),
            pl.BlockSpec((1, D), lambda i: (0, 0)),
        ],
        out_specs=pl.BlockSpec((tm, D), lambda i: (i, 0)),
        compiler_params=pltpu.CompilerParams(dimension_semantics=("parallel",)),
    )(x.reshape(M, D), y.reshape(M, D), gamma, beta)
    return out.reshape(B, S, D)


def pallas_self_attention(qkv, mask, nhead, d_model, scale):
    """qkv:(B,S,3D) fused projection slab, mask:(S,S) additive or None -> (B,S,D)."""
    B, S, D3 = qkv.shape
    args = [qkv]
    in_specs = [pl.BlockSpec((1, S, D3), lambda b: (b, 0, 0))]
    if mask is not None:
        args.append(mask)
        in_specs.append(pl.BlockSpec(mask.shape, lambda b: (0, 0)))
    return pl.pallas_call(
        functools.partial(_self_attn_kernel, nhead=nhead, scale=scale,
                          d_model=d_model, has_mask=mask is not None),
        out_shape=jax.ShapeDtypeStruct((B, S, d_model), qkv.dtype),
        grid=(B,),
        in_specs=in_specs,
        out_specs=pl.BlockSpec((1, S, d_model), lambda b: (b, 0, 0)),
        compiler_params=pltpu.CompilerParams(dimension_semantics=("parallel",)),
    )(*args)


def pallas_cross_attention(q, kv, nhead, d_model, scale):
    """q:(B,Sq,D), kv:(B,Sk,2D) fused K/V slab -> (B,Sq,D)."""
    B, Sq, D = q.shape
    Sk, D2 = kv.shape[1], kv.shape[2]
    return pl.pallas_call(
        functools.partial(_cross_attn_kernel, nhead=nhead, scale=scale,
                          d_model=d_model),
        out_shape=jax.ShapeDtypeStruct((B, Sq, D), q.dtype),
        grid=(B,),
        in_specs=[
            pl.BlockSpec((1, Sq, D), lambda b: (b, 0, 0)),
            pl.BlockSpec((1, Sk, D2), lambda b: (b, 0, 0)),
        ],
        out_specs=pl.BlockSpec((1, Sq, D), lambda b: (b, 0, 0)),
        compiler_params=pltpu.CompilerParams(dimension_semantics=("parallel",)),
    )(q, kv)


# ---------------------------------------------------------------------------
# Transformer building blocks
# ---------------------------------------------------------------------------

def encoder_layer(x, p, nhead):
    B, S, D = x.shape
    scale = 1.0 / math.sqrt(D // nhead)
    # self-attention block (post-norm); fused QKV projection, no mask
    qkv = pallas_dense(x.reshape(B * S, D), p["sa_qkv_w"], p["sa_qkv_b"])
    a = pallas_self_attention(qkv.reshape(B, S, 3 * D), None, nhead, D, scale)
    a = pallas_dense(a.reshape(B * S, D), p["sa_out_w"], p["sa_out_b"]).reshape(B, S, D)
    x = add_layer_norm(x, a, p["n1_g"], p["n1_b"])
    # feed-forward block
    h = pallas_dense(x.reshape(B * S, D), p["ff1_w"], p["ff1_b"], activation="relu")
    f = pallas_dense(h, p["ff2_w"], p["ff2_b"]).reshape(B, S, D)
    x = add_layer_norm(x, f, p["n2_g"], p["n2_b"])
    return x


def decoder_layer(y, memory, p, nhead, tgt_mask):
    B, St, D = y.shape
    Ss = memory.shape[1]
    scale = 1.0 / math.sqrt(D // nhead)
    # masked self-attention
    qkv = pallas_dense(y.reshape(B * St, D), p["sa_qkv_w"], p["sa_qkv_b"])
    a = pallas_self_attention(qkv.reshape(B, St, 3 * D), tgt_mask, nhead, D, scale)
    a = pallas_dense(a.reshape(B * St, D), p["sa_out_w"], p["sa_out_b"]).reshape(B, St, D)
    y = add_layer_norm(y, a, p["n1_g"], p["n1_b"])
    # cross-attention over encoder memory (fused K/V projection)
    q = pallas_dense(y.reshape(B * St, D), p["ca_q_w"], p["ca_q_b"]).reshape(B, St, D)
    kv = pallas_dense(memory.reshape(B * Ss, D), p["ca_kv_w"], p["ca_kv_b"]).reshape(B, Ss, 2 * D)
    c = pallas_cross_attention(q, kv, nhead, D, scale)
    c = pallas_dense(c.reshape(B * St, D), p["ca_out_w"], p["ca_out_b"]).reshape(B, St, D)
    y = add_layer_norm(y, c, p["n2_g"], p["n2_b"])
    # feed-forward
    h = pallas_dense(y.reshape(B * St, D), p["ff1_w"], p["ff1_b"], activation="relu")
    f = pallas_dense(h, p["ff2_w"], p["ff2_b"]).reshape(B, St, D)
    y = add_layer_norm(y, f, p["n3_g"], p["n3_b"])
    return y


# ---------------------------------------------------------------------------
# Model: parameter init + forward
# ---------------------------------------------------------------------------

def make_positional_encoding(d_model, max_seq_length):
    pos = jnp.arange(max_seq_length, dtype=jnp.float32)[:, None]
    div = jnp.exp(jnp.arange(0, d_model, 2, dtype=jnp.float32)
                  * (-math.log(10000.0) / d_model))
    pe = jnp.zeros((max_seq_length, d_model), jnp.float32)
    pe = pe.at[:, 0::2].set(jnp.sin(pos * div))
    pe = pe.at[:, 1::2].set(jnp.cos(pos * div))
    return pe  # (max_seq_length, d_model)


def causal_mask(size):
    # additive mask: 0 on/below diagonal, large negative above
    # (matches torch _generate_square_subsequent_mask up to -inf vs -1e9)
    return jnp.triu(jnp.ones((size, size), jnp.float32), k=1) * (-1e9)


def init_params(key, input_dim, d_model, nhead, n_enc, n_dec, dim_ff,
                vocab_size, max_seq_length):
    scale = 0.02
    keys = iter(jax.random.split(key, 512))

    def w(k_dim, n_dim):  # stored pre-transposed (K, N) so no .T per forward
        return (scale * jax.random.normal(next(keys), (k_dim, n_dim))).astype(jnp.float32)

    def zeros(n):
        return jnp.zeros((1, n), jnp.float32)

    def ones(n):
        return jnp.ones((1, n), jnp.float32)

    def enc_layer():
        return {
            "sa_qkv_w": w(d_model, 3 * d_model), "sa_qkv_b": zeros(3 * d_model),
            "sa_out_w": w(d_model, d_model), "sa_out_b": zeros(d_model),
            "ff1_w": w(d_model, dim_ff), "ff1_b": zeros(dim_ff),
            "ff2_w": w(dim_ff, d_model), "ff2_b": zeros(d_model),
            "n1_g": ones(d_model), "n1_b": zeros(d_model),
            "n2_g": ones(d_model), "n2_b": zeros(d_model),
        }

    def dec_layer():
        p = enc_layer()
        p.update({
            "ca_q_w": w(d_model, d_model), "ca_q_b": zeros(d_model),
            "ca_kv_w": w(d_model, 2 * d_model), "ca_kv_b": zeros(2 * d_model),
            "ca_out_w": w(d_model, d_model), "ca_out_b": zeros(d_model),
            "n3_g": ones(d_model), "n3_b": zeros(d_model),
        })
        return p

    # pad vocab projection to a lane-dense multiple of 128 (slice logits in JAX)
    vpad = ((vocab_size + 127) // 128) * 128
    out_w = jnp.zeros((d_model, vpad), jnp.float32).at[:, :vocab_size].set(
        w(d_model, vocab_size))
    out_b = jnp.zeros((1, vpad), jnp.float32)

    return {
        "in_proj_w": w(input_dim, d_model), "in_proj_b": zeros(d_model),
        "tgt_embedding": w(vocab_size, d_model),
        "pe": make_positional_encoding(d_model, max_seq_length),
        "enc_layers": [enc_layer() for _ in range(n_enc)],
        "dec_layers": [dec_layer() for _ in range(n_dec)],
        "out_w": out_w, "out_b": out_b,
    }


def transformer_forward(params, src, tgt, nhead, vocab_size):
    """src: (B, S_src, input_dim) float32, tgt: (B, S_tgt) int32 token ids."""
    B, Ss, Di = src.shape
    St = tgt.shape[1]
    D = params["in_proj_w"].shape[1]

    # input projection + positional encoding (dropout = identity, eval mode)
    x = pallas_dense(src.reshape(B * Ss, Di),
                     params["in_proj_w"], params["in_proj_b"]).reshape(B, Ss, D)
    x = x + params["pe"][None, :Ss, :]

    # encoder stack
    for p in params["enc_layers"]:
        x = encoder_layer(x, p, nhead)
    memory = x

    # target embedding (gather stays in plain JAX glue) + positional encoding
    y = params["tgt_embedding"][tgt]                      # (B, St, D)
    y = y + params["pe"][None, :St, :]

    tgt_mask = causal_mask(St)
    for p in params["dec_layers"]:
        y = decoder_layer(y, memory, p, nhead, tgt_mask)

    # output vocabulary projection (lane-dense padded), slice back to vocab_size
    logits = pallas_dense(y.reshape(B * St, D), params["out_w"], params["out_b"])
    return logits.reshape(B, St, -1)[..., :vocab_size]


# ---------------------------------------------------------------------------
# Main
# ---------------------------------------------------------------------------

if __name__ == "__main__":
    # small, forward-consistent shapes
    B = 2
    S_SRC = 8
    S_TGT = 8
    INPUT_DIM = 16
    D_MODEL = 32
    NHEAD = 4
    N_ENC = 2
    N_DEC = 2
    DIM_FF = 64
    VOCAB = 100
    MAX_SEQ = 32

    key = jax.random.PRNGKey(0)
    k_par, k_src, k_tgt = jax.random.split(key, 3)

    params = init_params(k_par, INPUT_DIM, D_MODEL, NHEAD, N_ENC, N_DEC,
                         DIM_FF, VOCAB, MAX_SEQ)

    src = jax.random.normal(k_src, (B, S_SRC, INPUT_DIM), jnp.float32)
    tgt = jax.random.randint(k_tgt, (B, S_TGT), 0, VOCAB, dtype=jnp.int32)

    fwd = jax.jit(lambda p, s, t: transformer_forward(p, s, t, NHEAD, VOCAB))
    out = jax.block_until_ready(fwd(params, src, tgt))

    assert out.shape == (B, S_TGT, VOCAB), out.shape
    assert jnp.all(jnp.isfinite(out)), "non-finite output"
    print("KERNEL_OK")
</pallas_src>

<mosaic_0001>
module attributes {stable_mosaic.version = 11 : i64} {
  func.func @_dense_kernel(%arg0: i32, %arg1: i32, %arg2: i32, %arg3: memref<16x32xf32, #tpu.memory_space<vmem>>, %arg4: memref<32x96xf32, #tpu.memory_space<vmem>>, %arg5: memref<1x96xf32, #tpu.memory_space<vmem>>, %arg6: memref<16x96xf32, #tpu.memory_space<vmem>>, %arg7: memref<16x96xf32, #tpu.memory_space<vmem>>) attributes {dimension_semantics = [#tpu.dimension_semantics<parallel>, #tpu.dimension_semantics<parallel>, #tpu.dimension_semantics<arbitrary>], iteration_bounds = array<i64: 1, 1, 1>, scalar_prefetch = 0 : i64, scratch_operands = 1 : i64, tpu.core_type = #tpu.core_type<tc>, window_params = [{transform_indices = @transform_0, window_bounds = array<i64: 16, 32>}, {transform_indices = @transform_1, window_bounds = array<i64: 32, 96>}, {transform_indices = @transform_2, window_bounds = array<i64: 1, 96>}, {transform_indices = @transform_3, window_bounds = array<i64: 16, 96>}]} {
    %c0_i32 = arith.constant 0 : i32
    %0 = arith.cmpi eq, %arg2, %c0_i32 : i32
    %1 = arith.extui %0 : i1 to i32
    %c0_i32_0 = arith.constant 0 : i32
    %2 = arith.cmpi ne, %1, %c0_i32_0 : i32
    scf.if %2 {
      %cst_10 = arith.constant 0.000000e+00 : f32
      %12 = vector.broadcast %cst_10 : f32 to vector<16x96xf32>
      %c0_11 = arith.constant 0 : index
      %c0_12 = arith.constant 0 : index
      %13 = vector.load %arg7[%c0_11, %c0_12] : memref<16x96xf32, #tpu.memory_space<vmem>>, vector<16x96xf32>
      tpu.vector_store %arg7[%c0_11, %c0_12], %12 {strides = array<i32>} : memref<16x96xf32, #tpu.memory_space<vmem>>, vector<16x96xf32>,
    } else {
    }
    %c0 = arith.constant 0 : index
    %c0_1 = arith.constant 0 : index
    %3 = vector.load %arg3[%c0, %c0_1] : memref<16x32xf32, #tpu.memory_space<vmem>>, vector<16x32xf32>
    %c0_2 = arith.constant 0 : index
    %c0_3 = arith.constant 0 : index
    %4 = vector.load %arg4[%c0_2, %c0_3] : memref<32x96xf32, #tpu.memory_space<vmem>>, vector<32x96xf32>
    %c0_4 = arith.constant 0 : index
    %c0_5 = arith.constant 0 : index
    %5 = vector.load %arg7[%c0_4, %c0_5] : memref<16x96xf32, #tpu.memory_space<vmem>>, vector<16x96xf32>
    %cst = arith.constant dense<0.000000e+00> : vector<16x96xf32>
    %6 = tpu.matmul %3, %4, %cst {dimension_numbers = #tpu.dot_dimension_numbers<[1], [0], [0], [1], [0, 0, 1, 1], [], []>} : vector<16x32xf32>, vector<32x96xf32>, vector<16x96xf32> -> vector<16x96xf32>
    %7 = arith.addf %5, %6 : vector<16x96xf32>
    %c0_6 = arith.constant 0 : index
    %c0_7 = arith.constant 0 : index
    %8 = vector.load %arg7[%c0_6, %c0_7] : memref<16x96xf32, #tpu.memory_space<vmem>>, vector<16x96xf32>
    tpu.vector_store %arg7[%c0_6, %c0_7], %7 {strides = array<i32>} : memref<16x96xf32, #tpu.memory_space<vmem>>, vector<16x96xf32>,
    %c0_i32_8 = arith.constant 0 : i32
    %9 = arith.cmpi eq, %arg2, %c0_i32_8 : i32
    %10 = arith.extui %9 : i1 to i32
    %c0_i32_9 = arith.constant 0 : i32
    %11 = arith.cmpi ne, %10, %c0_i32_9 : i32
    scf.if %11 {
      %c0_10 = arith.constant 0 : index
      %c0_11 = arith.constant 0 : index
      %12 = vector.load %arg7[%c0_10, %c0_11] : memref<16x96xf32, #tpu.memory_space<vmem>>, vector<16x96xf32>
      %c0_12 = arith.constant 0 : index
      %c0_13 = arith.constant 0 : index
      %13 = vector.load %arg5[%c0_12, %c0_13] : memref<1x96xf32, #tpu.memory_space<vmem>>, vector<1x96xf32>
      %14 = vector.broadcast %13 : vector<1x96xf32> to vector<16x96xf32>
      %15 = arith.addf %12, %14 : vector<16x96xf32>
      %c0_14 = arith.constant 0 : index
      %c0_15 = arith.constant 0 : index
      %16 = vector.load %arg6[%c0_14, %c0_15] : memref<16x96xf32, #tpu.memory_space<vmem>>, vector<16x96xf32>
      tpu.vector_store %arg6[%c0_14, %c0_15], %15 {strides = array<i32>} : memref<16x96xf32, #tpu.memory_space<vmem>>, vector<16x96xf32>,
    } else {
    }
    return
  }
  func.func @transform_0(%arg0: i32, %arg1: i32, %arg2: i32) -> (i32, i32) {
    %c0_i32 = arith.constant 0 : i32
    return %arg0, %arg2 : i32, i32
  }
  func.func @transform_1(%arg0: i32, %arg1: i32, %arg2: i32) -> (i32, i32) {
    %c0_i32 = arith.constant 0 : i32
    return %arg2, %arg1 : i32, i32
  }
  func.func @transform_2(%arg0: i32, %arg1: i32, %arg2: i32) -> (i32, i32) {
    %c0_i32 = arith.constant 0 : i32
    %c0_i32_0 = arith.constant 0 : i32
    return %c0_i32, %arg1 : i32, i32
  }
  func.func @transform_3(%arg0: i32, %arg1: i32, %arg2: i32) -> (i32, i32) {
    %c0_i32 = arith.constant 0 : i32
    return %arg0, %arg1 : i32, i32
  }
}

module attributes {stable_mosaic.version = 11 : i64} {
  func.func @_dense_kernel(%arg0: i32, %arg1: i32, %arg2: i32, %arg3: memref<16x32xf32, #tpu.memory_space<vmem>>, %arg4: memref<32x32xf32, #tpu.memory_space<vmem>>, %arg5: memref<1x32xf32, #tpu.memory_space<vmem>>, %arg6: memref<16x32xf32, #tpu.memory_space<vmem>>, %arg7: memref<16x32xf32, #tpu.memory_space<vmem>>) attributes {dimension_semantics = [#tpu.dimension_semantics<parallel>, #tpu.dimension_semantics<parallel>, #tpu.dimension_semantics<arbitrary>], iteration_bounds = array<i64: 1, 1, 1>, scalar_prefetch = 0 : i64, scratch_operands = 1 : i64, tpu.core_type = #tpu.core_type<tc>, window_params = [{transform_indices = @transform_0, window_bounds = array<i64: 16, 32>}, {transform_indices = @transform_1, window_bounds = array<i64: 32, 32>}, {transform_indices = @transform_2, window_bounds = array<i64: 1, 32>}, {transform_indices = @transform_3, window_bounds = array<i64: 16, 32>}]} {
    %c0_i32 = arith.constant 0 : i32
    %0 = arith.cmpi eq, %arg2, %c0_i32 : i32
    %1 = arith.extui %0 : i1 to i32
    %c0_i32_0 = arith.constant 0 : i32
    %2 = arith.cmpi ne, %1, %c0_i32_0 : i32
    scf.if %2 {
      %cst_10 = arith.constant 0.000000e+00 : f32
      %12 = vector.broadcast %cst_10 : f32 to vector<16x32xf32>
      %c0_11 = arith.constant 0 : index
      %c0_12 = arith.constant 0 : index
      %13 = vector.load %arg7[%c0_11, %c0_12] : memref<16x32xf32, #tpu.memory_space<vmem>>, vector<16x32xf32>
      tpu.vector_store %arg7[%c0_11, %c0_12], %12 {strides = array<i32>} : memref<16x32xf32, #tpu.memory_space<vmem>>, vector<16x32xf32>,
    } else {
    }
    %c0 = arith.constant 0 : index
    %c0_1 = arith.constant 0 : index
    %3 = vector.load %arg3[%c0, %c0_1] : memref<16x32xf32, #tpu.memory_space<vmem>>, vector<16x32xf32>
    %c0_2 = arith.constant 0 : index
    %c0_3 = arith.constant 0 : index
    %4 = vector.load %arg4[%c0_2, %c0_3] : memref<32x32xf32, #tpu.memory_space<vmem>>, vector<32x32xf32>
    %c0_4 = arith.constant 0 : index
    %c0_5 = arith.constant 0 : index
    %5 = vector.load %arg7[%c0_4, %c0_5] : memref<16x32xf32, #tpu.memory_space<vmem>>, vector<16x32xf32>
    %cst = arith.constant dense<0.000000e+00> : vector<16x32xf32>
    %6 = tpu.matmul %3, %4, %cst {dimension_numbers = #tpu.dot_dimension_numbers<[1], [0], [0], [1], [0, 0, 1, 1], [], []>} : vector<16x32xf32>, vector<32x32xf32>, vector<16x32xf32> -> vector<16x32xf32>
    %7 = arith.addf %5, %6 : vector<16x32xf32>
    %c0_6 = arith.constant 0 : index
    %c0_7 = arith.constant 0 : index
    %8 = vector.load %arg7[%c0_6, %c0_7] : memref<16x32xf32, #tpu.memory_space<vmem>>, vector<16x32xf32>
    tpu.vector_store %arg7[%c0_6, %c0_7], %7 {strides = array<i32>} : memref<16x32xf32, #tpu.memory_space<vmem>>, vector<16x32xf32>,
    %c0_i32_8 = arith.constant 0 : i32
    %9 = arith.cmpi eq, %arg2, %c0_i32_8 : i32
    %10 = arith.extui %9 : i1 to i32
    %c0_i32_9 = arith.constant 0 : i32
    %11 = arith.cmpi ne, %10, %c0_i32_9 : i32
    scf.if %11 {
      %c0_10 = arith.constant 0 : index
      %c0_11 = arith.constant 0 : index
      %12 = vector.load %arg7[%c0_10, %c0_11] : memref<16x32xf32, #tpu.memory_space<vmem>>, vector<16x32xf32>
      %c0_12 = arith.constant 0 : index
      %c0_13 = arith.constant 0 : index
      %13 = vector.load %arg5[%c0_12, %c0_13] : memref<1x32xf32, #tpu.memory_space<vmem>>, vector<1x32xf32>
      %14 = vector.broadcast %13 : vector<1x32xf32> to vector<16x32xf32>
      %15 = arith.addf %12, %14 : vector<16x32xf32>
      %c0_14 = arith.constant 0 : index
      %c0_15 = arith.constant 0 : index
      %16 = vector.load %arg6[%c0_14, %c0_15] : memref<16x32xf32, #tpu.memory_space<vmem>>, vector<16x32xf32>
      tpu.vector_store %arg6[%c0_14, %c0_15], %15 {strides = array<i32>} : memref<16x32xf32, #tpu.memory_space<vmem>>, vector<16x32xf32>,
    } else {
    }
    return
  }
  func.func @transform_0(%arg0: i32, %arg1: i32, %arg2: i32) -> (i32, i32) {
    %c0_i32 = arith.constant 0 : i32
    return %arg0, %arg2 : i32, i32
  }
  func.func @transform_1(%arg0: i32, %arg1: i32, %arg2: i32) -> (i32, i32) {
    %c0_i32 = arith.constant 0 : i32
    return %arg2, %arg1 : i32, i32
  }
  func.func @transform_2(%arg0: i32, %arg1: i32, %arg2: i32) -> (i32, i32) {
    %c0_i32 = arith.constant 0 : i32
    %c0_i32_0 = arith.constant 0 : i32
    return %c0_i32, %arg1 : i32, i32
  }
  func.func @transform_3(%arg0: i32, %arg1: i32, %arg2: i32) -> (i32, i32) {
    %c0_i32 = arith.constant 0 : i32
    return %arg0, %arg1 : i32, i32
  }
}

module attributes {stable_mosaic.version = 11 : i64} {
  func.func @_dense_kernel(%arg0: i32, %arg1: i32, %arg2: i32, %arg3: memref<16x16xf32, #tpu.memory_space<vmem>>, %arg4: memref<16x32xf32, #tpu.memory_space<vmem>>, %arg5: memref<1x32xf32, #tpu.memory_space<vmem>>, %arg6: memref<16x32xf32, #tpu.memory_space<vmem>>, %arg7: memref<16x32xf32, #tpu.memory_space<vmem>>) attributes {dimension_semantics = [#tpu.dimension_semantics<parallel>, #tpu.dimension_semantics<parallel>, #tpu.dimension_semantics<arbitrary>], iteration_bounds = array<i64: 1, 1, 1>, scalar_prefetch = 0 : i64, scratch_operands = 1 : i64, tpu.core_type = #tpu.core_type<tc>, window_params = [{transform_indices = @transform_0, window_bounds = array<i64: 16, 16>}, {transform_indices = @transform_1, window_bounds = array<i64: 16, 32>}, {transform_indices = @transform_2, window_bounds = array<i64: 1, 32>}, {transform_indices = @transform_3, window_bounds = array<i64: 16, 32>}]} {
    %c0_i32 = arith.constant 0 : i32
    %0 = arith.cmpi eq, %arg2, %c0_i32 : i32
    %1 = arith.extui %0 : i1 to i32
    %c0_i32_0 = arith.constant 0 : i32
    %2 = arith.cmpi ne, %1, %c0_i32_0 : i32
    scf.if %2 {
      %cst_10 = arith.constant 0.000000e+00 : f32
      %12 = vector.broadcast %cst_10 : f32 to vector<16x32xf32>
      %c0_11 = arith.constant 0 : index
      %c0_12 = arith.constant 0 : index
      %13 = vector.load %arg7[%c0_11, %c0_12] : memref<16x32xf32, #tpu.memory_space<vmem>>, vector<16x32xf32>
      tpu.vector_store %arg7[%c0_11, %c0_12], %12 {strides = array<i32>} : memref<16x32xf32, #tpu.memory_space<vmem>>, vector<16x32xf32>,
    } else {
    }
    %c0 = arith.constant 0 : index
    %c0_1 = arith.constant 0 : index
    %3 = vector.load %arg3[%c0, %c0_1] : memref<16x16xf32, #tpu.memory_space<vmem>>, vector<16x16xf32>
    %c0_2 = arith.constant 0 : index
    %c0_3 = arith.constant 0 : index
    %4 = vector.load %arg4[%c0_2, %c0_3] : memref<16x32xf32, #tpu.memory_space<vmem>>, vector<16x32xf32>
    %c0_4 = arith.constant 0 : index
    %c0_5 = arith.constant 0 : index
    %5 = vector.load %arg7[%c0_4, %c0_5] : memref<16x32xf32, #tpu.memory_space<vmem>>, vector<16x32xf32>
    %cst = arith.constant dense<0.000000e+00> : vector<16x32xf32>
    %6 = tpu.matmul %3, %4, %cst {dimension_numbers = #tpu.dot_dimension_numbers<[1], [0], [0], [1], [0, 0, 1, 1], [], []>} : vector<16x16xf32>, vector<16x32xf32>, vector<16x32xf32> -> vector<16x32xf32>
    %7 = arith.addf %5, %6 : vector<16x32xf32>
    %c0_6 = arith.constant 0 : index
    %c0_7 = arith.constant 0 : index
    %8 = vector.load %arg7[%c0_6, %c0_7] : memref<16x32xf32, #tpu.memory_space<vmem>>, vector<16x32xf32>
    tpu.vector_store %arg7[%c0_6, %c0_7], %7 {strides = array<i32>} : memref<16x32xf32, #tpu.memory_space<vmem>>, vector<16x32xf32>,
    %c0_i32_8 = arith.constant 0 : i32
    %9 = arith.cmpi eq, %arg2, %c0_i32_8 : i32
    %10 = arith.extui %9 : i1 to i32
    %c0_i32_9 = arith.constant 0 : i32
    %11 = arith.cmpi ne, %10, %c0_i32_9 : i32
    scf.if %11 {
      %c0_10 = arith.constant 0 : index
      %c0_11 = arith.constant 0 : index
      %12 = vector.load %arg7[%c0_10, %c0_11] : memref<16x32xf32, #tpu.memory_space<vmem>>, vector<16x32xf32>
      %c0_12 = arith.constant 0 : index
      %c0_13 = arith.constant 0 : index
      %13 = vector.load %arg5[%c0_12, %c0_13] : memref<1x32xf32, #tpu.memory_space<vmem>>, vector<1x32xf32>
      %14 = vector.broadcast %13 : vector<1x32xf32> to vector<16x32xf32>
      %15 = arith.addf %12, %14 : vector<16x32xf32>
      %c0_14 = arith.constant 0 : index
      %c0_15 = arith.constant 0 : index
      %16 = vector.load %arg6[%c0_14, %c0_15] : memref<16x32xf32, #tpu.memory_space<vmem>>, vector<16x32xf32>
      tpu.vector_store %arg6[%c0_14, %c0_15], %15 {strides = array<i32>} : memref<16x32xf32, #tpu.memory_space<vmem>>, vector<16x32xf32>,
    } else {
    }
    return
  }
  func.func @transform_0(%arg0: i32, %arg1: i32, %arg2: i32) -> (i32, i32) {
    %c0_i32 = arith.constant 0 : i32
    return %arg0, %arg2 : i32, i32
  }
  func.func @transform_1(%arg0: i32, %arg1: i32, %arg2: i32) -> (i32, i32) {
    %c0_i32 = arith.constant 0 : i32
    return %arg2, %arg1 : i32, i32
  }
  func.func @transform_2(%arg0: i32, %arg1: i32, %arg2: i32) -> (i32, i32) {
    %c0_i32 = arith.constant 0 : i32
    %c0_i32_0 = arith.constant 0 : i32
    return %c0_i32, %arg1 : i32, i32
  }
  func.func @transform_3(%arg0: i32, %arg1: i32, %arg2: i32) -> (i32, i32) {
    %c0_i32 = arith.constant 0 : i32
    return %arg0, %arg1 : i32, i32
  }
}

module attributes {stable_mosaic.version = 11 : i64} {
  func.func @_self_attn_kernel(%arg0: i32, %arg1: memref<1x8x96xf32, #tpu.memory_space<vmem>>, %arg2: memref<1x8x32xf32, #tpu.memory_space<vmem>>) attributes {dimension_semantics = [#tpu.dimension_semantics<parallel>], iteration_bounds = array<i64: 2>, scalar_prefetch = 0 : i64, scratch_operands = 0 : i64, tpu.core_type = #tpu.core_type<tc>, window_params = [{transform_indices = @transform_0, window_bounds = array<i64: 1, 8, 96>}, {transform_indices = @transform_1, window_bounds = array<i64: 1, 8, 32>}]} {
    %c0 = arith.constant 0 : index
    %c0_0 = arith.constant 0 : index
    %c0_1 = arith.constant 0 : index
    %0 = vector.load %arg1[%c0, %c0_0, %c0_1] : memref<1x8x96xf32, #tpu.memory_space<vmem>>, vector<1x8x96xf32>
    %1 = vector.shape_cast %0 : vector<1x8x96xf32> to vector<8x96xf32>
    %2 = vector.extract_strided_slice %1 {offsets = [0, 0], sizes = [8, 32], strides = [1, 1]} : vector<8x96xf32> to vector<8x32xf32>
    %3 = vector.extract_strided_slice %1 {offsets = [0, 32], sizes = [8, 32], strides = [1, 1]} : vector<8x96xf32> to vector<8x32xf32>
    %4 = vector.extract_strided_slice %1 {offsets = [0, 64], sizes = [8, 32], strides = [1, 1]} : vector<8x96xf32> to vector<8x32xf32>
    %5 = vector.extract_strided_slice %2 {offsets = [0, 0], sizes = [8, 8], strides = [1, 1]} : vector<8x32xf32> to vector<8x8xf32>
    %6 = vector.extract_strided_slice %3 {offsets = [0, 0], sizes = [8, 8], strides = [1, 1]} : vector<8x32xf32> to vector<8x8xf32>
    %7 = vector.extract_strided_slice %4 {offsets = [0, 0], sizes = [8, 8], strides = [1, 1]} : vector<8x32xf32> to vector<8x8xf32>
    %cst = arith.constant dense<0.000000e+00> : vector<8x8xf32>
    %8 = tpu.matmul %5, %6, %cst {dimension_numbers = #tpu.dot_dimension_numbers<[1], [1], [0], [0], [0, 0, 1, 0], [], []>} : vector<8x8xf32>, vector<8x8xf32>, vector<8x8xf32> -> vector<8x8xf32>
    %cst_2 = arith.constant 0.353553385 : f32
    %9 = vector.broadcast %cst_2 : f32 to vector<8x8xf32>
    %10 = arith.mulf %8, %9 : vector<8x8xf32>
    %cst_3 = arith.constant dense<0xFF800000> : vector<8xf32>
    %11 = vector.multi_reduction <maximumf>, %10, %cst_3 [1] : vector<8x8xf32> to vector<8xf32>
    %12 = vector.shape_cast %11 : vector<8xf32> to vector<8x1xf32>
    %13 = vector.broadcast %12 : vector<8x1xf32> to vector<8x8xf32>
    %14 = arith.subf %10, %13 : vector<8x8xf32>
    %15 = math.exp %14 : vector<8x8xf32>
    %cst_4 = arith.constant dense<0.000000e+00> : vector<8xf32>
    %16 = vector.multi_reduction <add>, %15, %cst_4 [1] : vector<8x8xf32> to vector<8xf32>
    %17 = vector.shape_cast %16 : vector<8xf32> to vector<8x1xf32>
    %18 = tpu.reciprocal %17 {approx = true} : vector<8x1xf32> -> vector<8x1xf32>
    %19 = vector.broadcast %18 : vector<8x1xf32> to vector<8x8xf32>
    %20 = arith.mulf %15, %19 : vector<8x8xf32>
    %cst_5 = arith.constant dense<0.000000e+00> : vector<8x8xf32>
    %21 = tpu.matmul %20, %7, %cst_5 {dimension_numbers = #tpu.dot_dimension_numbers<[1], [0], [0], [1], [0, 0, 1, 1], [], []>} : vector<8x8xf32>, vector<8x8xf32>, vector<8x8xf32> -> vector<8x8xf32>
    %22 = vector.extract_strided_slice %2 {offsets = [0, 8], sizes = [8, 8], strides = [1, 1]} : vector<8x32xf32> to vector<8x8xf32>
    %23 = vector.extract_strided_slice %3 {offsets = [0, 8], sizes = [8, 8], strides = [1, 1]} : vector<8x32xf32> to vector<8x8xf32>
    %24 = vector.extract_strided_slice %4 {offsets = [0, 8], sizes = [8, 8], strides = [1, 1]} : vector<8x32xf32> to vector<8x8xf32>
    %cst_6 = arith.constant dense<0.000000e+00> : vector<8x8xf32>
    %25 = tpu.matmul %22, %23, %cst_6 {dimension_numbers = #tpu.dot_dimension_numbers<[1], [1], [0], [0], [0, 0, 1, 0], [], []>} : vector<8x8xf32>, vector<8x8xf32>, vector<8x8xf32> -> vector<8x8xf32>
    %cst_7 = arith.constant 0.353553385 : f32
    %26 = vector.broadcast %cst_7 : f32 to vector<8x8xf32>
    %27 = arith.mulf %25, %26 : vector<8x8xf32>
    %cst_8 = arith.constant dense<0xFF800000> : vector<8xf32>
    %28 = vector.multi_reduction <maximumf>, %27, %cst_8 [1] : vector<8x8xf32> to vector<8xf32>
    %29 = vector.shape_cast %28 : vector<8xf32> to vector<8x1xf32>
    %30 = vector.broadcast %29 : vector<8x1xf32> to vector<8x8xf32>
    %31 = arith.subf %27, %30 : vector<8x8xf32>
    %32 = math.exp %31 : vector<8x8xf32>
    %cst_9 = arith.constant dense<0.000000e+00> : vector<8xf32>
    %33 = vector.multi_reduction <add>, %32, %cst_9 [1] : vector<8x8xf32> to vector<8xf32>
    %34 = vector.shape_cast %33 : vector<8xf32> to vector<8x1xf32>
    %35 = tpu.reciprocal %34 {approx = true} : vector<8x1xf32> -> vector<8x1xf32>
    %36 = vector.broadcast %35 : vector<8x1xf32> to vector<8x8xf32>
    %37 = arith.mulf %32, %36 : vector<8x8xf32>
    %cst_10 = arith.constant dense<0.000000e+00> : vector<8x8xf32>
    %38 = tpu.matmul %37, %24, %cst_10 {dimension_numbers = #tpu.dot_dimension_numbers<[1], [0], [0], [1], [0, 0, 1, 1], [], []>} : vector<8x8xf32>, vector<8x8xf32>, vector<8x8xf32> -> vector<8x8xf32>
    %39 = vector.extract_strided_slice %2 {offsets = [0, 16], sizes = [8, 8], strides = [1, 1]} : vector<8x32xf32> to vector<8x8xf32>
    %40 = vector.extract_strided_slice %3 {offsets = [0, 16], sizes = [8, 8], strides = [1, 1]} : vector<8x32xf32> to vector<8x8xf32>
    %41 = vector.extract_strided_slice %4 {offsets = [0, 16], sizes = [8, 8], strides = [1, 1]} : vector<8x32xf32> to vector<8x8xf32>
    %cst_11 = arith.constant dense<0.000000e+00> : vector<8x8xf32>
    %42 = tpu.matmul %39, %40, %cst_11 {dimension_numbers = #tpu.dot_dimension_numbers<[1], [1], [0], [0], [0, 0, 1, 0], [], []>} : vector<8x8xf32>, vector<8x8xf32>, vector<8x8xf32> -> vector<8x8xf32>
    %cst_12 = arith.constant 0.353553385 : f32
    %43 = vector.broadcast %cst_12 : f32 to vector<8x8xf32>
    %44 = arith.mulf %42, %43 : vector<8x8xf32>
    %cst_13 = arith.constant dense<0xFF800000> : vector<8xf32>
    %45 = vector.multi_reduction <maximumf>, %44, %cst_13 [1] : vector<8x8xf32> to vector<8xf32>
    %46 = vector.shape_cast %45 : vector<8xf32> to vector<8x1xf32>
    %47 = vector.broadcast %46 : vector<8x1xf32> to vector<8x8xf32>
    %48 = arith.subf %44, %47 : vector<8x8xf32>
    %49 = math.exp %48 : vector<8x8xf32>
    %cst_14 = arith.constant dense<0.000000e+00> : vector<8xf32>
    %50 = vector.multi_reduction <add>, %49, %cst_14 [1] : vector<8x8xf32> to vector<8xf32>
    %51 = vector.shape_cast %50 : vector<8xf32> to vector<8x1xf32>
    %52 = tpu.reciprocal %51 {approx = true} : vector<8x1xf32> -> vector<8x1xf32>
    %53 = vector.broadcast %52 : vector<8x1xf32> to vector<8x8xf32>
    %54 = arith.mulf %49, %53 : vector<8x8xf32>
    %cst_15 = arith.constant dense<0.000000e+00> : vector<8x8xf32>
    %55 = tpu.matmul %54, %41, %cst_15 {dimension_numbers = #tpu.dot_dimension_numbers<[1], [0], [0], [1], [0, 0, 1, 1], [], []>} : vector<8x8xf32>, vector<8x8xf32>, vector<8x8xf32> -> vector<8x8xf32>
    %56 = vector.extract_strided_slice %2 {offsets = [0, 24], sizes = [8, 8], strides = [1, 1]} : vector<8x32xf32> to vector<8x8xf32>
    %57 = vector.extract_strided_slice %3 {offsets = [0, 24], sizes = [8, 8], strides = [1, 1]} : vector<8x32xf32> to vector<8x8xf32>
    %58 = vector.extract_strided_slice %4 {offsets = [0, 24], sizes = [8, 8], strides = [1, 1]} : vector<8x32xf32> to vector<8x8xf32>
    %cst_16 = arith.constant dense<0.000000e+00> : vector<8x8xf32>
    %59 = tpu.matmul %56, %57, %cst_16 {dimension_numbers = #tpu.dot_dimension_numbers<[1], [1], [0], [0], [0, 0, 1, 0], [], []>} : vector<8x8xf32>, vector<8x8xf32>, vector<8x8xf32> -> vector<8x8xf32>
    %cst_17 = arith.constant 0.353553385 : f32
    %60 = vector.broadcast %cst_17 : f32 to vector<8x8xf32>
    %61 = arith.mulf %59, %60 : vector<8x8xf32>
    %cst_18 = arith.constant dense<0xFF800000> : vector<8xf32>
    %62 = vector.multi_reduction <maximumf>, %61, %cst_18 [1] : vector<8x8xf32> to vector<8xf32>
    %63 = vector.shape_cast %62 : vector<8xf32> to vector<8x1xf32>
    %64 = vector.broadcast %63 : vector<8x1xf32> to vector<8x8xf32>
    %65 = arith.subf %61, %64 : vector<8x8xf32>
    %66 = math.exp %65 : vector<8x8xf32>
    %cst_19 = arith.constant dense<0.000000e+00> : vector<8xf32>
    %67 = vector.multi_reduction <add>, %66, %cst_19 [1] : vector<8x8xf32> to vector<8xf32>
    %68 = vector.shape_cast %67 : vector<8xf32> to vector<8x1xf32>
    %69 = tpu.reciprocal %68 {approx = true} : vector<8x1xf32> -> vector<8x1xf32>
    %70 = vector.broadcast %69 : vector<8x1xf32> to vector<8x8xf32>
    %71 = arith.mulf %66, %70 : vector<8x8xf32>
    %cst_20 = arith.constant dense<0.000000e+00> : vector<8x8xf32>
    %72 = tpu.matmul %71, %58, %cst_20 {dimension_numbers = #tpu.dot_dimension_numbers<[1], [0], [0], [1], [0, 0, 1, 1], [], []>} : vector<8x8xf32>, vector<8x8xf32>, vector<8x8xf32> -> vector<8x8xf32>
    %73 = tpu.concatenate %21, %38, %55, %72 in 1 : vector<8x8xf32>, vector<8x8xf32>, vector<8x8xf32>, vector<8x8xf32> -> vector<8x32xf32>
    %c0_21 = arith.constant 0 : index
    %c0_22 = arith.constant 0 : index
    %c0_23 = arith.constant 0 : index
    %74 = vector.load %arg2[%c0_21, %c0_22, %c0_23] : memref<1x8x32xf32, #tpu.memory_space<vmem>>, vector<1x8x32xf32>
    %75 = vector.shape_cast %74 : vector<1x8x32xf32> to vector<8x32xf32>
    %76 = vector.shape_cast %73 : vector<8x32xf32> to vector<1x8x32xf32>
    tpu.vector_store %arg2[%c0_21, %c0_22, %c0_23], %76 {strides = array<i32>} : memref<1x8x32xf32, #tpu.memory_space<vmem>>, vector<1x8x32xf32>,
    return
  }
  func.func @transform_0(%arg0: i32) -> (i32, i32, i32) {
    %c0_i32 = arith.constant 0 : i32
    %c0_i32_0 = arith.constant 0 : i32
    %c0_i32_1 = arith.constant 0 : i32
    return %arg0, %c0_i32, %c0_i32_0 : i32, i32, i32
  }
  func.func @transform_1(%arg0: i32) -> (i32, i32, i32) {
    %c0_i32 = arith.constant 0 : i32
    %c0_i32_0 = arith.constant 0 : i32
    %c0_i32_1 = arith.constant 0 : i32
    return %arg0, %c0_i32, %c0_i32_0 : i32, i32, i32
  }
}

module attributes {stable_mosaic.version = 11 : i64} {
  func.func @_add_layernorm_kernel(%arg0: i32, %arg1: memref<16x32xf32, #tpu.memory_space<vmem>>, %arg2: memref<16x32xf32, #tpu.memory_space<vmem>>, %arg3: memref<1x32xf32, #tpu.memory_space<vmem>>, %arg4: memref<1x32xf32, #tpu.memory_space<vmem>>, %arg5: memref<16x32xf32, #tpu.memory_space<vmem>>) attributes {dimension_semantics = [#tpu.dimension_semantics<parallel>], iteration_bounds = array<i64: 1>, scalar_prefetch = 0 : i64, scratch_operands = 0 : i64, tpu.core_type = #tpu.core_type<tc>, window_params = [{transform_indices = @transform_0, window_bounds = array<i64: 16, 32>}, {transform_indices = @transform_1, window_bounds = array<i64: 16, 32>}, {pipeline_mode = #tpu.pipeline_mode<synchronous>, transform_indices = @transform_2, window_bounds = array<i64: 1, 32>}, {pipeline_mode = #tpu.pipeline_mode<synchronous>, transform_indices = @transform_3, window_bounds = array<i64: 1, 32>}, {transform_indices = @transform_4, window_bounds = array<i64: 16, 32>}]} {
    %c0 = arith.constant 0 : index
    %c0_0 = arith.constant 0 : index
    %0 = vector.load %arg1[%c0, %c0_0] : memref<16x32xf32, #tpu.memory_space<vmem>>, vector<16x32xf32>
    %c0_1 = arith.constant 0 : index
    %c0_2 = arith.constant 0 : index
    %1 = vector.load %arg2[%c0_1, %c0_2] : memref<16x32xf32, #tpu.memory_space<vmem>>, vector<16x32xf32>
    %2 = arith.addf %0, %1 : vector<16x32xf32>
    %cst = arith.constant dense<0.000000e+00> : vector<16xf32>
    %3 = vector.multi_reduction <add>, %2, %cst [1] : vector<16x32xf32> to vector<16xf32>
    %4 = vector.shape_cast %3 : vector<16xf32> to vector<16x1xf32>
    %cst_3 = arith.constant 3.200000e+01 : f32
    %5 = vector.broadcast %cst_3 : f32 to vector<16x1xf32>
    %6 = arith.divf %4, %5 : vector<16x1xf32>
    %7 = vector.broadcast %6 : vector<16x1xf32> to vector<16x32xf32>
    %8 = arith.subf %2, %7 : vector<16x32xf32>
    %9 = arith.mulf %8, %8 : vector<16x32xf32>
    %cst_4 = arith.constant dense<0.000000e+00> : vector<16xf32>
    %10 = vector.multi_reduction <add>, %9, %cst_4 [1] : vector<16x32xf32> to vector<16xf32>
    %11 = vector.shape_cast %10 : vector<16xf32> to vector<16x1xf32>
    %cst_5 = arith.constant 3.200000e+01 : f32
    %12 = vector.broadcast %cst_5 : f32 to vector<16x1xf32>
    %13 = arith.divf %11, %12 : vector<16x1xf32>
    %cst_6 = arith.constant 9.99999974E-6 : f32
    %14 = vector.broadcast %cst_6 : f32 to vector<16x1xf32>
    %15 = arith.addf %13, %14 : vector<16x1xf32>
    %16 = math.rsqrt %15 : vector<16x1xf32>
    %17 = vector.broadcast %16 : vector<16x1xf32> to vector<16x32xf32>
    %18 = arith.mulf %8, %17 : vector<16x32xf32>
    %c0_7 = arith.constant 0 : index
    %c0_8 = arith.constant 0 : index
    %19 = vector.load %arg3[%c0_7, %c0_8] : memref<1x32xf32, #tpu.memory_space<vmem>>, vector<1x32xf32>
    %20 = vector.broadcast %19 : vector<1x32xf32> to vector<16x32xf32>
    %21 = arith.mulf %18, %20 : vector<16x32xf32>
    %c0_9 = arith.constant 0 : index
    %c0_10 = arith.constant 0 : index
    %22 = vector.load %arg4[%c0_9, %c0_10] : memref<1x32xf32, #tpu.memory_space<vmem>>, vector<1x32xf32>
    %23 = vector.broadcast %22 : vector<1x32xf32> to vector<16x32xf32>
    %24 = arith.addf %21, %23 : vector<16x32xf32>
    %c0_11 = arith.constant 0 : index
    %c0_12 = arith.constant 0 : index
    %25 = vector.load %arg5[%c0_11, %c0_12] : memref<16x32xf32, #tpu.memory_space<vmem>>, vector<16x32xf32>
    tpu.vector_store %arg5[%c0_11, %c0_12], %24 {strides = array<i32>} : memref<16x32xf32, #tpu.memory_space<vmem>>, vector<16x32xf32>,
    return
  }
  func.func @transform_0(%arg0: i32) -> (i32, i32) {
    %c0_i32 = arith.constant 0 : i32
    %c0_i32_0 = arith.constant 0 : i32
    return %arg0, %c0_i32 : i32, i32
  }
  func.func @transform_1(%arg0: i32) -> (i32, i32) {
    %c0_i32 = arith.constant 0 : i32
    %c0_i32_0 = arith.constant 0 : i32
    return %arg0, %c0_i32 : i32, i32
  }
  func.func @transform_2(%arg0: i32) -> (i32, i32) {
    %c0_i32 = arith.constant 0 : i32
    %c0_i32_0 = arith.constant 0 : i32
    %c0_i32_1 = arith.constant 0 : i32
    return %c0_i32, %c0_i32_0 : i32, i32
  }
  func.func @transform_3(%arg0: i32) -> (i32, i32) {
    %c0_i32 = arith.constant 0 : i32
    %c0_i32_0 = arith.constant 0 : i32
    %c0_i32_1 = arith.constant 0 : i32
    return %c0_i32, %c0_i32_0 : i32, i32
  }
  func.func @transform_4(%arg0: i32) -> (i32, i32) {
    %c0_i32 = arith.constant 0 : i32
    %c0_i32_0 = arith.constant 0 : i32
    return %arg0, %c0_i32 : i32, i32
  }
}

module attributes {stable_mosaic.version = 11 : i64} {
  func.func @_dense_kernel(%arg0: i32, %arg1: i32, %arg2: i32, %arg3: memref<16x32xf32, #tpu.memory_space<vmem>>, %arg4: memref<32x64xf32, #tpu.memory_space<vmem>>, %arg5: memref<1x64xf32, #tpu.memory_space<vmem>>, %arg6: memref<16x64xf32, #tpu.memory_space<vmem>>, %arg7: memref<16x64xf32, #tpu.memory_space<vmem>>) attributes {dimension_semantics = [#tpu.dimension_semantics<parallel>, #tpu.dimension_semantics<parallel>, #tpu.dimension_semantics<arbitrary>], iteration_bounds = array<i64: 1, 1, 1>, scalar_prefetch = 0 : i64, scratch_operands = 1 : i64, tpu.core_type = #tpu.core_type<tc>, window_params = [{transform_indices = @transform_0, window_bounds = array<i64: 16, 32>}, {transform_indices = @transform_1, window_bounds = array<i64: 32, 64>}, {transform_indices = @transform_2, window_bounds = array<i64: 1, 64>}, {transform_indices = @transform_3, window_bounds = array<i64: 16, 64>}]} {
    %c0_i32 = arith.constant 0 : i32
    %0 = arith.cmpi eq, %arg2, %c0_i32 : i32
    %1 = arith.extui %0 : i1 to i32
    %c0_i32_0 = arith.constant 0 : i32
    %2 = arith.cmpi ne, %1, %c0_i32_0 : i32
    scf.if %2 {
      %cst_10 = arith.constant 0.000000e+00 : f32
      %12 = vector.broadcast %cst_10 : f32 to vector<16x64xf32>
      %c0_11 = arith.constant 0 : index
      %c0_12 = arith.constant 0 : index
      %13 = vector.load %arg7[%c0_11, %c0_12] : memref<16x64xf32, #tpu.memory_space<vmem>>, vector<16x64xf32>
      tpu.vector_store %arg7[%c0_11, %c0_12], %12 {strides = array<i32>} : memref<16x64xf32, #tpu.memory_space<vmem>>, vector<16x64xf32>,
    } else {
    }
    %c0 = arith.constant 0 : index
    %c0_1 = arith.constant 0 : index
    %3 = vector.load %arg3[%c0, %c0_1] : memref<16x32xf32, #tpu.memory_space<vmem>>, vector<16x32xf32>
    %c0_2 = arith.constant 0 : index
    %c0_3 = arith.constant 0 : index
    %4 = vector.load %arg4[%c0_2, %c0_3] : memref<32x64xf32, #tpu.memory_space<vmem>>, vector<32x64xf32>
    %c0_4 = arith.constant 0 : index
    %c0_5 = arith.constant 0 : index
    %5 = vector.load %arg7[%c0_4, %c0_5] : memref<16x64xf32, #tpu.memory_space<vmem>>, vector<16x64xf32>
    %cst = arith.constant dense<0.000000e+00> : vector<16x64xf32>
    %6 = tpu.matmul %3, %4, %cst {dimension_numbers = #tpu.dot_dimension_numbers<[1], [0], [0], [1], [0, 0, 1, 1], [], []>} : vector<16x32xf32>, vector<32x64xf32>, vector<16x64xf32> -> vector<16x64xf32>
    %7 = arith.addf %5, %6 : vector<16x64xf32>
    %c0_6 = arith.constant 0 : index
    %c0_7 = arith.constant 0 : index
    %8 = vector.load %arg7[%c0_6, %c0_7] : memref<16x64xf32, #tpu.memory_space<vmem>>, vector<16x64xf32>
    tpu.vector_store %arg7[%c0_6, %c0_7], %7 {strides = array<i32>} : memref<16x64xf32, #tpu.memory_space<vmem>>, vector<16x64xf32>,
    %c0_i32_8 = arith.constant 0 : i32
    %9 = arith.cmpi eq, %arg2, %c0_i32_8 : i32
    %10 = arith.extui %9 : i1 to i32
    %c0_i32_9 = arith.constant 0 : i32
    %11 = arith.cmpi ne, %10, %c0_i32_9 : i32
    scf.if %11 {
      %c0_10 = arith.constant 0 : index
      %c0_11 = arith.constant 0 : index
      %12 = vector.load %arg7[%c0_10, %c0_11] : memref<16x64xf32, #tpu.memory_space<vmem>>, vector<16x64xf32>
      %c0_12 = arith.constant 0 : index
      %c0_13 = arith.constant 0 : index
      %13 = vector.load %arg5[%c0_12, %c0_13] : memref<1x64xf32, #tpu.memory_space<vmem>>, vector<1x64xf32>
      %14 = vector.broadcast %13 : vector<1x64xf32> to vector<16x64xf32>
      %15 = arith.addf %12, %14 : vector<16x64xf32>
      %cst_14 = arith.constant 0.000000e+00 : f32
      %16 = vector.broadcast %cst_14 : f32 to vector<16x64xf32>
      %17 = arith.maximumf %15, %16 : vector<16x64xf32>
      %c0_15 = arith.constant 0 : index
      %c0_16 = arith.constant 0 : index
      %18 = vector.load %arg6[%c0_15, %c0_16] : memref<16x64xf32, #tpu.memory_space<vmem>>, vector<16x64xf32>
      tpu.vector_store %arg6[%c0_15, %c0_16], %17 {strides = array<i32>} : memref<16x64xf32, #tpu.memory_space<vmem>>, vector<16x64xf32>,
    } else {
    }
    return
  }
  func.func @transform_0(%arg0: i32, %arg1: i32, %arg2: i32) -> (i32, i32) {
    %c0_i32 = arith.constant 0 : i32
    return %arg0, %arg2 : i32, i32
  }
  func.func @transform_1(%arg0: i32, %arg1: i32, %arg2: i32) -> (i32, i32) {
    %c0_i32 = arith.constant 0 : i32
    return %arg2, %arg1 : i32, i32
  }
  func.func @transform_2(%arg0: i32, %arg1: i32, %arg2: i32) -> (i32, i32) {
    %c0_i32 = arith.constant 0 : i32
    %c0_i32_0 = arith.constant 0 : i32
    return %c0_i32, %arg1 : i32, i32
  }
  func.func @transform_3(%arg0: i32, %arg1: i32, %arg2: i32) -> (i32, i32) {
    %c0_i32 = arith.constant 0 : i32
    return %arg0, %arg1 : i32, i32
  }
}

module attributes {stable_mosaic.version = 11 : i64} {
  func.func @_dense_kernel(%arg0: i32, %arg1: i32, %arg2: i32, %arg3: memref<16x64xf32, #tpu.memory_space<vmem>>, %arg4: memref<64x32xf32, #tpu.memory_space<vmem>>, %arg5: memref<1x32xf32, #tpu.memory_space<vmem>>, %arg6: memref<16x32xf32, #tpu.memory_space<vmem>>, %arg7: memref<16x32xf32, #tpu.memory_space<vmem>>) attributes {dimension_semantics = [#tpu.dimension_semantics<parallel>, #tpu.dimension_semantics<parallel>, #tpu.dimension_semantics<arbitrary>], iteration_bounds = array<i64: 1, 1, 1>, scalar_prefetch = 0 : i64, scratch_operands = 1 : i64, tpu.core_type = #tpu.core_type<tc>, window_params = [{transform_indices = @transform_0, window_bounds = array<i64: 16, 64>}, {transform_indices = @transform_1, window_bounds = array<i64: 64, 32>}, {transform_indices = @transform_2, window_bounds = array<i64: 1, 32>}, {transform_indices = @transform_3, window_bounds = array<i64: 16, 32>}]} {
    %c0_i32 = arith.constant 0 : i32
    %0 = arith.cmpi eq, %arg2, %c0_i32 : i32
    %1 = arith.extui %0 : i1 to i32
    %c0_i32_0 = arith.constant 0 : i32
    %2 = arith.cmpi ne, %1, %c0_i32_0 : i32
    scf.if %2 {
      %cst_10 = arith.constant 0.000000e+00 : f32
      %12 = vector.broadcast %cst_10 : f32 to vector<16x32xf32>
      %c0_11 = arith.constant 0 : index
      %c0_12 = arith.constant 0 : index
      %13 = vector.load %arg7[%c0_11, %c0_12] : memref<16x32xf32, #tpu.memory_space<vmem>>, vector<16x32xf32>
      tpu.vector_store %arg7[%c0_11, %c0_12], %12 {strides = array<i32>} : memref<16x32xf32, #tpu.memory_space<vmem>>, vector<16x32xf32>,
    } else {
    }
    %c0 = arith.constant 0 : index
    %c0_1 = arith.constant 0 : index
    %3 = vector.load %arg3[%c0, %c0_1] : memref<16x64xf32, #tpu.memory_space<vmem>>, vector<16x64xf32>
    %c0_2 = arith.constant 0 : index
    %c0_3 = arith.constant 0 : index
    %4 = vector.load %arg4[%c0_2, %c0_3] : memref<64x32xf32, #tpu.memory_space<vmem>>, vector<64x32xf32>
    %c0_4 = arith.constant 0 : index
    %c0_5 = arith.constant 0 : index
    %5 = vector.load %arg7[%c0_4, %c0_5] : memref<16x32xf32, #tpu.memory_space<vmem>>, vector<16x32xf32>
    %cst = arith.constant dense<0.000000e+00> : vector<16x32xf32>
    %6 = tpu.matmul %3, %4, %cst {dimension_numbers = #tpu.dot_dimension_numbers<[1], [0], [0], [1], [0, 0, 1, 1], [], []>} : vector<16x64xf32>, vector<64x32xf32>, vector<16x32xf32> -> vector<16x32xf32>
    %7 = arith.addf %5, %6 : vector<16x32xf32>
    %c0_6 = arith.constant 0 : index
    %c0_7 = arith.constant 0 : index
    %8 = vector.load %arg7[%c0_6, %c0_7] : memref<16x32xf32, #tpu.memory_space<vmem>>, vector<16x32xf32>
    tpu.vector_store %arg7[%c0_6, %c0_7], %7 {strides = array<i32>} : memref<16x32xf32, #tpu.memory_space<vmem>>, vector<16x32xf32>,
    %c0_i32_8 = arith.constant 0 : i32
    %9 = arith.cmpi eq, %arg2, %c0_i32_8 : i32
    %10 = arith.extui %9 : i1 to i32
    %c0_i32_9 = arith.constant 0 : i32
    %11 = arith.cmpi ne, %10, %c0_i32_9 : i32
    scf.if %11 {
      %c0_10 = arith.constant 0 : index
      %c0_11 = arith.constant 0 : index
      %12 = vector.load %arg7[%c0_10, %c0_11] : memref<16x32xf32, #tpu.memory_space<vmem>>, vector<16x32xf32>
      %c0_12 = arith.constant 0 : index
      %c0_13 = arith.constant 0 : index
      %13 = vector.load %arg5[%c0_12, %c0_13] : memref<1x32xf32, #tpu.memory_space<vmem>>, vector<1x32xf32>
      %14 = vector.broadcast %13 : vector<1x32xf32> to vector<16x32xf32>
      %15 = arith.addf %12, %14 : vector<16x32xf32>
      %c0_14 = arith.constant 0 : index
      %c0_15 = arith.constant 0 : index
      %16 = vector.load %arg6[%c0_14, %c0_15] : memref<16x32xf32, #tpu.memory_space<vmem>>, vector<16x32xf32>
      tpu.vector_store %arg6[%c0_14, %c0_15], %15 {strides = array<i32>} : memref<16x32xf32, #tpu.memory_space<vmem>>, vector<16x32xf32>,
    } else {
    }
    return
  }
  func.func @transform_0(%arg0: i32, %arg1: i32, %arg2: i32) -> (i32, i32) {
    %c0_i32 = arith.constant 0 : i32
    return %arg0, %arg2 : i32, i32
  }
  func.func @transform_1(%arg0: i32, %arg1: i32, %arg2: i32) -> (i32, i32) {
    %c0_i32 = arith.constant 0 : i32
    return %arg2, %arg1 : i32, i32
  }
  func.func @transform_2(%arg0: i32, %arg1: i32, %arg2: i32) -> (i32, i32) {
    %c0_i32 = arith.constant 0 : i32
    %c0_i32_0 = arith.constant 0 : i32
    return %c0_i32, %arg1 : i32, i32
  }
  func.func @transform_3(%arg0: i32, %arg1: i32, %arg2: i32) -> (i32, i32) {
    %c0_i32 = arith.constant 0 : i32
    return %arg0, %arg1 : i32, i32
  }
}

module attributes {stable_mosaic.version = 11 : i64} {
  func.func @_dense_kernel(%arg0: i32, %arg1: i32, %arg2: i32, %arg3: memref<16x32xf32, #tpu.memory_space<vmem>>, %arg4: memref<32x64xf32, #tpu.memory_space<vmem>>, %arg5: memref<1x64xf32, #tpu.memory_space<vmem>>, %arg6: memref<16x64xf32, #tpu.memory_space<vmem>>, %arg7: memref<16x64xf32, #tpu.memory_space<vmem>>) attributes {dimension_semantics = [#tpu.dimension_semantics<parallel>, #tpu.dimension_semantics<parallel>, #tpu.dimension_semantics<arbitrary>], iteration_bounds = array<i64: 1, 1, 1>, scalar_prefetch = 0 : i64, scratch_operands = 1 : i64, tpu.core_type = #tpu.core_type<tc>, window_params = [{transform_indices = @transform_0, window_bounds = array<i64: 16, 32>}, {transform_indices = @transform_1, window_bounds = array<i64: 32, 64>}, {transform_indices = @transform_2, window_bounds = array<i64: 1, 64>}, {transform_indices = @transform_3, window_bounds = array<i64: 16, 64>}]} {
    %c0_i32 = arith.constant 0 : i32
    %0 = arith.cmpi eq, %arg2, %c0_i32 : i32
    %1 = arith.extui %0 : i1 to i32
    %c0_i32_0 = arith.constant 0 : i32
    %2 = arith.cmpi ne, %1, %c0_i32_0 : i32
    scf.if %2 {
      %cst_10 = arith.constant 0.000000e+00 : f32
      %12 = vector.broadcast %cst_10 : f32 to vector<16x64xf32>
      %c0_11 = arith.constant 0 : index
      %c0_12 = arith.constant 0 : index
      %13 = vector.load %arg7[%c0_11, %c0_12] : memref<16x64xf32, #tpu.memory_space<vmem>>, vector<16x64xf32>
      tpu.vector_store %arg7[%c0_11, %c0_12], %12 {strides = array<i32>} : memref<16x64xf32, #tpu.memory_space<vmem>>, vector<16x64xf32>,
    } else {
    }
    %c0 = arith.constant 0 : index
    %c0_1 = arith.constant 0 : index
    %3 = vector.load %arg3[%c0, %c0_1] : memref<16x32xf32, #tpu.memory_space<vmem>>, vector<16x32xf32>
    %c0_2 = arith.constant 0 : index
    %c0_3 = arith.constant 0 : index
    %4 = vector.load %arg4[%c0_2, %c0_3] : memref<32x64xf32, #tpu.memory_space<vmem>>, vector<32x64xf32>
    %c0_4 = arith.constant 0 : index
    %c0_5 = arith.constant 0 : index
    %5 = vector.load %arg7[%c0_4, %c0_5] : memref<16x64xf32, #tpu.memory_space<vmem>>, vector<16x64xf32>
    %cst = arith.constant dense<0.000000e+00> : vector<16x64xf32>
    %6 = tpu.matmul %3, %4, %cst {dimension_numbers = #tpu.dot_dimension_numbers<[1], [0], [0], [1], [0, 0, 1, 1], [], []>} : vector<16x32xf32>, vector<32x64xf32>, vector<16x64xf32> -> vector<16x64xf32>
    %7 = arith.addf %5, %6 : vector<16x64xf32>
    %c0_6 = arith.constant 0 : index
    %c0_7 = arith.constant 0 : index
    %8 = vector.load %arg7[%c0_6, %c0_7] : memref<16x64xf32, #tpu.memory_space<vmem>>, vector<16x64xf32>
    tpu.vector_store %arg7[%c0_6, %c0_7], %7 {strides = array<i32>} : memref<16x64xf32, #tpu.memory_space<vmem>>, vector<16x64xf32>,
    %c0_i32_8 = arith.constant 0 : i32
    %9 = arith.cmpi eq, %arg2, %c0_i32_8 : i32
    %10 = arith.extui %9 : i1 to i32
    %c0_i32_9 = arith.constant 0 : i32
    %11 = arith.cmpi ne, %10, %c0_i32_9 : i32
    scf.if %11 {
      %c0_10 = arith.constant 0 : index
      %c0_11 = arith.constant 0 : index
      %12 = vector.load %arg7[%c0_10, %c0_11] : memref<16x64xf32, #tpu.memory_space<vmem>>, vector<16x64xf32>
      %c0_12 = arith.constant 0 : index
      %c0_13 = arith.constant 0 : index
      %13 = vector.load %arg5[%c0_12, %c0_13] : memref<1x64xf32, #tpu.memory_space<vmem>>, vector<1x64xf32>
      %14 = vector.broadcast %13 : vector<1x64xf32> to vector<16x64xf32>
      %15 = arith.addf %12, %14 : vector<16x64xf32>
      %c0_14 = arith.constant 0 : index
      %c0_15 = arith.constant 0 : index
      %16 = vector.load %arg6[%c0_14, %c0_15] : memref<16x64xf32, #tpu.memory_space<vmem>>, vector<16x64xf32>
      tpu.vector_store %arg6[%c0_14, %c0_15], %15 {strides = array<i32>} : memref<16x64xf32, #tpu.memory_space<vmem>>, vector<16x64xf32>,
    } else {
    }
    return
  }
  func.func @transform_0(%arg0: i32, %arg1: i32, %arg2: i32) -> (i32, i32) {
    %c0_i32 = arith.constant 0 : i32
    return %arg0, %arg2 : i32, i32
  }
  func.func @transform_1(%arg0: i32, %arg1: i32, %arg2: i32) -> (i32, i32) {
    %c0_i32 = arith.constant 0 : i32
    return %arg2, %arg1 : i32, i32
  }
  func.func @transform_2(%arg0: i32, %arg1: i32, %arg2: i32) -> (i32, i32) {
    %c0_i32 = arith.constant 0 : i32
    %c0_i32_0 = arith.constant 0 : i32
    return %c0_i32, %arg1 : i32, i32
  }
  func.func @transform_3(%arg0: i32, %arg1: i32, %arg2: i32) -> (i32, i32) {
    %c0_i32 = arith.constant 0 : i32
    return %arg0, %arg1 : i32, i32
  }
}

module attributes {stable_mosaic.version = 11 : i64} {
  func.func @_self_attn_kernel(%arg0: i32, %arg1: memref<1x8x96xf32, #tpu.memory_space<vmem>>, %arg2: memref<8x8xf32, #tpu.memory_space<vmem>>, %arg3: memref<1x8x32xf32, #tpu.memory_space<vmem>>) attributes {dimension_semantics = [#tpu.dimension_semantics<parallel>], iteration_bounds = array<i64: 2>, scalar_prefetch = 0 : i64, scratch_operands = 0 : i64, tpu.core_type = #tpu.core_type<tc>, window_params = [{transform_indices = @transform_0, window_bounds = array<i64: 1, 8, 96>}, {pipeline_mode = #tpu.pipeline_mode<synchronous>, transform_indices = @transform_1, window_bounds = array<i64: 8, 8>}, {transform_indices = @transform_2, window_bounds = array<i64: 1, 8, 32>}]} {
    %c0 = arith.constant 0 : index
    %c0_0 = arith.constant 0 : index
    %0 = vector.load %arg2[%c0, %c0_0] : memref<8x8xf32, #tpu.memory_space<vmem>>, vector<8x8xf32>
    %c0_1 = arith.constant 0 : index
    %c0_2 = arith.constant 0 : index
    %c0_3 = arith.constant 0 : index
    %1 = vector.load %arg1[%c0_1, %c0_2, %c0_3] : memref<1x8x96xf32, #tpu.memory_space<vmem>>, vector<1x8x96xf32>
    %2 = vector.shape_cast %1 : vector<1x8x96xf32> to vector<8x96xf32>
    %3 = vector.extract_strided_slice %2 {offsets = [0, 0], sizes = [8, 32], strides = [1, 1]} : vector<8x96xf32> to vector<8x32xf32>
    %4 = vector.extract_strided_slice %2 {offsets = [0, 32], sizes = [8, 32], strides = [1, 1]} : vector<8x96xf32> to vector<8x32xf32>
    %5 = vector.extract_strided_slice %2 {offsets = [0, 64], sizes = [8, 32], strides = [1, 1]} : vector<8x96xf32> to vector<8x32xf32>
    %6 = vector.extract_strided_slice %3 {offsets = [0, 0], sizes = [8, 8], strides = [1, 1]} : vector<8x32xf32> to vector<8x8xf32>
    %7 = vector.extract_strided_slice %4 {offsets = [0, 0], sizes = [8, 8], strides = [1, 1]} : vector<8x32xf32> to vector<8x8xf32>
    %8 = vector.extract_strided_slice %5 {offsets = [0, 0], sizes = [8, 8], strides = [1, 1]} : vector<8x32xf32> to vector<8x8xf32>
    %cst = arith.constant dense<0.000000e+00> : vector<8x8xf32>
    %9 = tpu.matmul %6, %7, %cst {dimension_numbers = #tpu.dot_dimension_numbers<[1], [1], [0], [0], [0, 0, 1, 0], [], []>} : vector<8x8xf32>, vector<8x8xf32>, vector<8x8xf32> -> vector<8x8xf32>
    %cst_4 = arith.constant 0.353553385 : f32
    %10 = vector.broadcast %cst_4 : f32 to vector<8x8xf32>
    %11 = arith.mulf %9, %10 : vector<8x8xf32>
    %12 = arith.addf %11, %0 : vector<8x8xf32>
    %cst_5 = arith.constant dense<0xFF800000> : vector<8xf32>
    %13 = vector.multi_reduction <maximumf>, %12, %cst_5 [1] : vector<8x8xf32> to vector<8xf32>
    %14 = vector.shape_cast %13 : vector<8xf32> to vector<8x1xf32>
    %15 = vector.broadcast %14 : vector<8x1xf32> to vector<8x8xf32>
    %16 = arith.subf %12, %15 : vector<8x8xf32>
    %17 = math.exp %16 : vector<8x8xf32>
    %cst_6 = arith.constant dense<0.000000e+00> : vector<8xf32>
    %18 = vector.multi_reduction <add>, %17, %cst_6 [1] : vector<8x8xf32> to vector<8xf32>
    %19 = vector.shape_cast %18 : vector<8xf32> to vector<8x1xf32>
    %20 = tpu.reciprocal %19 {approx = true} : vector<8x1xf32> -> vector<8x1xf32>
    %21 = vector.broadcast %20 : vector<8x1xf32> to vector<8x8xf32>
    %22 = arith.mulf %17, %21 : vector<8x8xf32>
    %cst_7 = arith.constant dense<0.000000e+00> : vector<8x8xf32>
    %23 = tpu.matmul %22, %8, %cst_7 {dimension_numbers = #tpu.dot_dimension_numbers<[1], [0], [0], [1], [0, 0, 1, 1], [], []>} : vector<8x8xf32>, vector<8x8xf32>, vector<8x8xf32> -> vector<8x8xf32>
    %24 = vector.extract_strided_slice %3 {offsets = [0, 8], sizes = [8, 8], strides = [1, 1]} : vector<8x32xf32> to vector<8x8xf32>
    %25 = vector.extract_strided_slice %4 {offsets = [0, 8], sizes = [8, 8], strides = [1, 1]} : vector<8x32xf32> to vector<8x8xf32>
    %26 = vector.extract_strided_slice %5 {offsets = [0, 8], sizes = [8, 8], strides = [1, 1]} : vector<8x32xf32> to vector<8x8xf32>
    %cst_8 = arith.constant dense<0.000000e+00> : vector<8x8xf32>
    %27 = tpu.matmul %24, %25, %cst_8 {dimension_numbers = #tpu.dot_dimension_numbers<[1], [1], [0], [0], [0, 0, 1, 0], [], []>} : vector<8x8xf32>, vector<8x8xf32>, vector<8x8xf32> -> vector<8x8xf32>
    %cst_9 = arith.constant 0.353553385 : f32
    %28 = vector.broadcast %cst_9 : f32 to vector<8x8xf32>
    %29 = arith.mulf %27, %28 : vector<8x8xf32>
    %30 = arith.addf %29, %0 : vector<8x8xf32>
    %cst_10 = arith.constant dense<0xFF800000> : vector<8xf32>
    %31 = vector.multi_reduction <maximumf>, %30, %cst_10 [1] : vector<8x8xf32> to vector<8xf32>
    %32 = vector.shape_cast %31 : vector<8xf32> to vector<8x1xf32>
    %33 = vector.broadcast %32 : vector<8x1xf32> to vector<8x8xf32>
    %34 = arith.subf %30, %33 : vector<8x8xf32>
    %35 = math.exp %34 : vector<8x8xf32>
    %cst_11 = arith.constant dense<0.000000e+00> : vector<8xf32>
    %36 = vector.multi_reduction <add>, %35, %cst_11 [1] : vector<8x8xf32> to vector<8xf32>
    %37 = vector.shape_cast %36 : vector<8xf32> to vector<8x1xf32>
    %38 = tpu.reciprocal %37 {approx = true} : vector<8x1xf32> -> vector<8x1xf32>
    %39 = vector.broadcast %38 : vector<8x1xf32> to vector<8x8xf32>
    %40 = arith.mulf %35, %39 : vector<8x8xf32>
    %cst_12 = arith.constant dense<0.000000e+00> : vector<8x8xf32>
    %41 = tpu.matmul %40, %26, %cst_12 {dimension_numbers = #tpu.dot_dimension_numbers<[1], [0], [0], [1], [0, 0, 1, 1], [], []>} : vector<8x8xf32>, vector<8x8xf32>, vector<8x8xf32> -> vector<8x8xf32>
    %42 = vector.extract_strided_slice %3 {offsets = [0, 16], sizes = [8, 8], strides = [1, 1]} : vector<8x32xf32> to vector<8x8xf32>
    %43 = vector.extract_strided_slice %4 {offsets = [0, 16], sizes = [8, 8], strides = [1, 1]} : vector<8x32xf32> to vector<8x8xf32>
    %44 = vector.extract_strided_slice %5 {offsets = [0, 16], sizes = [8, 8], strides = [1, 1]} : vector<8x32xf32> to vector<8x8xf32>
    %cst_13 = arith.constant dense<0.000000e+00> : vector<8x8xf32>
    %45 = tpu.matmul %42, %43, %cst_13 {dimension_numbers = #tpu.dot_dimension_numbers<[1], [1], [0], [0], [0, 0, 1, 0], [], []>} : vector<8x8xf32>, vector<8x8xf32>, vector<8x8xf32> -> vector<8x8xf32>
    %cst_14 = arith.constant 0.353553385 : f32
    %46 = vector.broadcast %cst_14 : f32 to vector<8x8xf32>
    %47 = arith.mulf %45, %46 : vector<8x8xf32>
    %48 = arith.addf %47, %0 : vector<8x8xf32>
    %cst_15 = arith.constant dense<0xFF800000> : vector<8xf32>
    %49 = vector.multi_reduction <maximumf>, %48, %cst_15 [1] : vector<8x8xf32> to vector<8xf32>
    %50 = vector.shape_cast %49 : vector<8xf32> to vector<8x1xf32>
    %51 = vector.broadcast %50 : vector<8x1xf32> to vector<8x8xf32>
    %52 = arith.subf %48, %51 : vector<8x8xf32>
    %53 = math.exp %52 : vector<8x8xf32>
    %cst_16 = arith.constant dense<0.000000e+00> : vector<8xf32>
    %54 = vector.multi_reduction <add>, %53, %cst_16 [1] : vector<8x8xf32> to vector<8xf32>
    %55 = vector.shape_cast %54 : vector<8xf32> to vector<8x1xf32>
    %56 = tpu.reciprocal %55 {approx = true} : vector<8x1xf32> -> vector<8x1xf32>
    %57 = vector.broadcast %56 : vector<8x1xf32> to vector<8x8xf32>
    %58 = arith.mulf %53, %57 : vector<8x8xf32>
    %cst_17 = arith.constant dense<0.000000e+00> : vector<8x8xf32>
    %59 = tpu.matmul %58, %44, %cst_17 {dimension_numbers = #tpu.dot_dimension_numbers<[1], [0], [0], [1], [0, 0, 1, 1], [], []>} : vector<8x8xf32>, vector<8x8xf32>, vector<8x8xf32> -> vector<8x8xf32>
    %60 = vector.extract_strided_slice %3 {offsets = [0, 24], sizes = [8, 8], strides = [1, 1]} : vector<8x32xf32> to vector<8x8xf32>
    %61 = vector.extract_strided_slice %4 {offsets = [0, 24], sizes = [8, 8], strides = [1, 1]} : vector<8x32xf32> to vector<8x8xf32>
    %62 = vector.extract_strided_slice %5 {offsets = [0, 24], sizes = [8, 8], strides = [1, 1]} : vector<8x32xf32> to vector<8x8xf32>
    %cst_18 = arith.constant dense<0.000000e+00> : vector<8x8xf32>
    %63 = tpu.matmul %60, %61, %cst_18 {dimension_numbers = #tpu.dot_dimension_numbers<[1], [1], [0], [0], [0, 0, 1, 0], [], []>} : vector<8x8xf32>, vector<8x8xf32>, vector<8x8xf32> -> vector<8x8xf32>
    %cst_19 = arith.constant 0.353553385 : f32
    %64 = vector.broadcast %cst_19 : f32 to vector<8x8xf32>
    %65 = arith.mulf %63, %64 : vector<8x8xf32>
    %66 = arith.addf %65, %0 : vector<8x8xf32>
    %cst_20 = arith.constant dense<0xFF800000> : vector<8xf32>
    %67 = vector.multi_reduction <maximumf>, %66, %cst_20 [1] : vector<8x8xf32> to vector<8xf32>
    %68 = vector.shape_cast %67 : vector<8xf32> to vector<8x1xf32>
    %69 = vector.broadcast %68 : vector<8x1xf32> to vector<8x8xf32>
    %70 = arith.subf %66, %69 : vector<8x8xf32>
    %71 = math.exp %70 : vector<8x8xf32>
    %cst_21 = arith.constant dense<0.000000e+00> : vector<8xf32>
    %72 = vector.multi_reduction <add>, %71, %cst_21 [1] : vector<8x8xf32> to vector<8xf32>
    %73 = vector.shape_cast %72 : vector<8xf32> to vector<8x1xf32>
    %74 = tpu.reciprocal %73 {approx = true} : vector<8x1xf32> -> vector<8x1xf32>
    %75 = vector.broadcast %74 : vector<8x1xf32> to vector<8x8xf32>
    %76 = arith.mulf %71, %75 : vector<8x8xf32>
    %cst_22 = arith.constant dense<0.000000e+00> : vector<8x8xf32>
    %77 = tpu.matmul %76, %62, %cst_22 {dimension_numbers = #tpu.dot_dimension_numbers<[1], [0], [0], [1], [0, 0, 1, 1], [], []>} : vector<8x8xf32>, vector<8x8xf32>, vector<8x8xf32> -> vector<8x8xf32>
    %78 = tpu.concatenate %23, %41, %59, %77 in 1 : vector<8x8xf32>, vector<8x8xf32>, vector<8x8xf32>, vector<8x8xf32> -> vector<8x32xf32>
    %c0_23 = arith.constant 0 : index
    %c0_24 = arith.constant 0 : index
    %c0_25 = arith.constant 0 : index
    %79 = vector.load %arg3[%c0_23, %c0_24, %c0_25] : memref<1x8x32xf32, #tpu.memory_space<vmem>>, vector<1x8x32xf32>
    %80 = vector.shape_cast %79 : vector<1x8x32xf32> to vector<8x32xf32>
    %81 = vector.shape_cast %78 : vector<8x32xf32> to vector<1x8x32xf32>
    tpu.vector_store %arg3[%c0_23, %c0_24, %c0_25], %81 {strides = array<i32>} : memref<1x8x32xf32, #tpu.memory_space<vmem>>, vector<1x8x32xf32>,
    return
  }
  func.func @transform_0(%arg0: i32) -> (i32, i32, i32) {
    %c0_i32 = arith.constant 0 : i32
    %c0_i32_0 = arith.constant 0 : i32
    %c0_i32_1 = arith.constant 0 : i32
    return %arg0, %c0_i32, %c0_i32_0 : i32, i32, i32
  }
  func.func @transform_1(%arg0: i32) -> (i32, i32) {
    %c0_i32 = arith.constant 0 : i32
    %c0_i32_0 = arith.constant 0 : i32
    %c0_i32_1 = arith.constant 0 : i32
    return %c0_i32, %c0_i32_0 : i32, i32
  }
  func.func @transform_2(%arg0: i32) -> (i32, i32, i32) {
    %c0_i32 = arith.constant 0 : i32
    %c0_i32_0 = arith.constant 0 : i32
    %c0_i32_1 = arith.constant 0 : i32
    return %arg0, %c0_i32, %c0_i32_0 : i32, i32, i32
  }
}

module attributes {stable_mosaic.version = 11 : i64} {
  func.func @_dense_kernel(%arg0: i32, %arg1: i32, %arg2: i32, %arg3: memref<16x32xf32, #tpu.memory_space<vmem>>, %arg4: memref<32x128xf32, #tpu.memory_space<vmem>>, %arg5: memref<1x128xf32, #tpu.memory_space<vmem>>, %arg6: memref<16x128xf32, #tpu.memory_space<vmem>>, %arg7: memref<16x128xf32, #tpu.memory_space<vmem>>) attributes {dimension_semantics = [#tpu.dimension_semantics<parallel>, #tpu.dimension_semantics<parallel>, #tpu.dimension_semantics<arbitrary>], iteration_bounds = array<i64: 1, 1, 1>, scalar_prefetch = 0 : i64, scratch_operands = 1 : i64, tpu.core_type = #tpu.core_type<tc>, window_params = [{transform_indices = @transform_0, window_bounds = array<i64: 16, 32>}, {transform_indices = @transform_1, window_bounds = array<i64: 32, 128>}, {transform_indices = @transform_2, window_bounds = array<i64: 1, 128>}, {transform_indices = @transform_3, window_bounds = array<i64: 16, 128>}]} {
    %c0_i32 = arith.constant 0 : i32
    %0 = arith.cmpi eq, %arg2, %c0_i32 : i32
    %1 = arith.extui %0 : i1 to i32
    %c0_i32_0 = arith.constant 0 : i32
    %2 = arith.cmpi ne, %1, %c0_i32_0 : i32
    scf.if %2 {
      %cst_10 = arith.constant 0.000000e+00 : f32
      %12 = vector.broadcast %cst_10 : f32 to vector<16x128xf32>
      %c0_11 = arith.constant 0 : index
      %c0_12 = arith.constant 0 : index
      %13 = vector.load %arg7[%c0_11, %c0_12] : memref<16x128xf32, #tpu.memory_space<vmem>>, vector<16x128xf32>
      tpu.vector_store %arg7[%c0_11, %c0_12], %12 {strides = array<i32>} : memref<16x128xf32, #tpu.memory_space<vmem>>, vector<16x128xf32>,
    } else {
    }
    %c0 = arith.constant 0 : index
    %c0_1 = arith.constant 0 : index
    %3 = vector.load %arg3[%c0, %c0_1] : memref<16x32xf32, #tpu.memory_space<vmem>>, vector<16x32xf32>
    %c0_2 = arith.constant 0 : index
    %c0_3 = arith.constant 0 : index
    %4 = vector.load %arg4[%c0_2, %c0_3] : memref<32x128xf32, #tpu.memory_space<vmem>>, vector<32x128xf32>
    %c0_4 = arith.constant 0 : index
    %c0_5 = arith.constant 0 : index
    %5 = vector.load %arg7[%c0_4, %c0_5] : memref<16x128xf32, #tpu.memory_space<vmem>>, vector<16x128xf32>
    %cst = arith.constant dense<0.000000e+00> : vector<16x128xf32>
    %6 = tpu.matmul %3, %4, %cst {dimension_numbers = #tpu.dot_dimension_numbers<[1], [0], [0], [1], [0, 0, 1, 1], [], []>} : vector<16x32xf32>, vector<32x128xf32>, vector<16x128xf32> -> vector<16x128xf32>
    %7 = arith.addf %5, %6 : vector<16x128xf32>
    %c0_6 = arith.constant 0 : index
    %c0_7 = arith.constant 0 : index
    %8 = vector.load %arg7[%c0_6, %c0_7] : memref<16x128xf32, #tpu.memory_space<vmem>>, vector<16x128xf32>
    tpu.vector_store %arg7[%c0_6, %c0_7], %7 {strides = array<i32>} : memref<16x128xf32, #tpu.memory_space<vmem>>, vector<16x128xf32>,
    %c0_i32_8 = arith.constant 0 : i32
    %9 = arith.cmpi eq, %arg2, %c0_i32_8 : i32
    %10 = arith.extui %9 : i1 to i32
    %c0_i32_9 = arith.constant 0 : i32
    %11 = arith.cmpi ne, %10, %c0_i32_9 : i32
    scf.if %11 {
      %c0_10 = arith.constant 0 : index
      %c0_11 = arith.constant 0 : index
      %12 = vector.load %arg7[%c0_10, %c0_11] : memref<16x128xf32, #tpu.memory_space<vmem>>, vector<16x128xf32>
      %c0_12 = arith.constant 0 : index
      %c0_13 = arith.constant 0 : index
      %13 = vector.load %arg5[%c0_12, %c0_13] : memref<1x128xf32, #tpu.memory_space<vmem>>, vector<1x128xf32>
      %14 = vector.broadcast %13 : vector<1x128xf32> to vector<16x128xf32>
      %15 = arith.addf %12, %14 : vector<16x128xf32>
      %c0_14 = arith.constant 0 : index
      %c0_15 = arith.constant 0 : index
      %16 = vector.load %arg6[%c0_14, %c0_15] : memref<16x128xf32, #tpu.memory_space<vmem>>, vector<16x128xf32>
      tpu.vector_store %arg6[%c0_14, %c0_15], %15 {strides = array<i32>} : memref<16x128xf32, #tpu.memory_space<vmem>>, vector<16x128xf32>,
    } else {
    }
    return
  }
  func.func @transform_0(%arg0: i32, %arg1: i32, %arg2: i32) -> (i32, i32) {
    %c0_i32 = arith.constant 0 : i32
    return %arg0, %arg2 : i32, i32
  }
  func.func @transform_1(%arg0: i32, %arg1: i32, %arg2: i32) -> (i32, i32) {
    %c0_i32 = arith.constant 0 : i32
    return %arg2, %arg1 : i32, i32
  }
  func.func @transform_2(%arg0: i32, %arg1: i32, %arg2: i32) -> (i32, i32) {
    %c0_i32 = arith.constant 0 : i32
    %c0_i32_0 = arith.constant 0 : i32
    return %c0_i32, %arg1 : i32, i32
  }
  func.func @transform_3(%arg0: i32, %arg1: i32, %arg2: i32) -> (i32, i32) {
    %c0_i32 = arith.constant 0 : i32
    return %arg0, %arg1 : i32, i32
  }
}

module attributes {stable_mosaic.version = 11 : i64} {
  func.func @_cross_attn_kernel(%arg0: i32, %arg1: memref<1x8x32xf32, #tpu.memory_space<vmem>>, %arg2: memref<1x8x64xf32, #tpu.memory_space<vmem>>, %arg3: memref<1x8x32xf32, #tpu.memory_space<vmem>>) attributes {dimension_semantics = [#tpu.dimension_semantics<parallel>], iteration_bounds = array<i64: 2>, scalar_prefetch = 0 : i64, scratch_operands = 0 : i64, tpu.core_type = #tpu.core_type<tc>, window_params = [{transform_indices = @transform_0, window_bounds = array<i64: 1, 8, 32>}, {transform_indices = @transform_1, window_bounds = array<i64: 1, 8, 64>}, {transform_indices = @transform_2, window_bounds = array<i64: 1, 8, 32>}]} {
    %c0 = arith.constant 0 : index
    %c0_0 = arith.constant 0 : index
    %c0_1 = arith.constant 0 : index
    %0 = vector.load %arg1[%c0, %c0_0, %c0_1] : memref<1x8x32xf32, #tpu.memory_space<vmem>>, vector<1x8x32xf32>
    %1 = vector.shape_cast %0 : vector<1x8x32xf32> to vector<8x32xf32>
    %c0_2 = arith.constant 0 : index
    %c0_3 = arith.constant 0 : index
    %c0_4 = arith.constant 0 : index
    %2 = vector.load %arg2[%c0_2, %c0_3, %c0_4] : memref<1x8x64xf32, #tpu.memory_space<vmem>>, vector<1x8x64xf32>
    %3 = vector.shape_cast %2 : vector<1x8x64xf32> to vector<8x64xf32>
    %4 = vector.extract_strided_slice %3 {offsets = [0, 0], sizes = [8, 32], strides = [1, 1]} : vector<8x64xf32> to vector<8x32xf32>
    %5 = vector.extract_strided_slice %3 {offsets = [0, 32], sizes = [8, 32], strides = [1, 1]} : vector<8x64xf32> to vector<8x32xf32>
    %6 = vector.extract_strided_slice %1 {offsets = [0, 0], sizes = [8, 8], strides = [1, 1]} : vector<8x32xf32> to vector<8x8xf32>
    %7 = vector.extract_strided_slice %4 {offsets = [0, 0], sizes = [8, 8], strides = [1, 1]} : vector<8x32xf32> to vector<8x8xf32>
    %8 = vector.extract_strided_slice %5 {offsets = [0, 0], sizes = [8, 8], strides = [1, 1]} : vector<8x32xf32> to vector<8x8xf32>
    %cst = arith.constant dense<0.000000e+00> : vector<8x8xf32>
    %9 = tpu.matmul %6, %7, %cst {dimension_numbers = #tpu.dot_dimension_numbers<[1], [1], [0], [0], [0, 0, 1, 0], [], []>} : vector<8x8xf32>, vector<8x8xf32>, vector<8x8xf32> -> vector<8x8xf32>
    %cst_5 = arith.constant 0.353553385 : f32
    %10 = vector.broadcast %cst_5 : f32 to vector<8x8xf32>
    %11 = arith.mulf %9, %10 : vector<8x8xf32>
    %cst_6 = arith.constant dense<0xFF800000> : vector<8xf32>
    %12 = vector.multi_reduction <maximumf>, %11, %cst_6 [1] : vector<8x8xf32> to vector<8xf32>
    %13 = vector.shape_cast %12 : vector<8xf32> to vector<8x1xf32>
    %14 = vector.broadcast %13 : vector<8x1xf32> to vector<8x8xf32>
    %15 = arith.subf %11, %14 : vector<8x8xf32>
    %16 = math.exp %15 : vector<8x8xf32>
    %cst_7 = arith.constant dense<0.000000e+00> : vector<8xf32>
    %17 = vector.multi_reduction <add>, %16, %cst_7 [1] : vector<8x8xf32> to vector<8xf32>
    %18 = vector.shape_cast %17 : vector<8xf32> to vector<8x1xf32>
    %19 = tpu.reciprocal %18 {approx = true} : vector<8x1xf32> -> vector<8x1xf32>
    %20 = vector.broadcast %19 : vector<8x1xf32> to vector<8x8xf32>
    %21 = arith.mulf %16, %20 : vector<8x8xf32>
    %cst_8 = arith.constant dense<0.000000e+00> : vector<8x8xf32>
    %22 = tpu.matmul %21, %8, %cst_8 {dimension_numbers = #tpu.dot_dimension_numbers<[1], [0], [0], [1], [0, 0, 1, 1], [], []>} : vector<8x8xf32>, vector<8x8xf32>, vector<8x8xf32> -> vector<8x8xf32>
    %23 = vector.extract_strided_slice %1 {offsets = [0, 8], sizes = [8, 8], strides = [1, 1]} : vector<8x32xf32> to vector<8x8xf32>
    %24 = vector.extract_strided_slice %4 {offsets = [0, 8], sizes = [8, 8], strides = [1, 1]} : vector<8x32xf32> to vector<8x8xf32>
    %25 = vector.extract_strided_slice %5 {offsets = [0, 8], sizes = [8, 8], strides = [1, 1]} : vector<8x32xf32> to vector<8x8xf32>
    %cst_9 = arith.constant dense<0.000000e+00> : vector<8x8xf32>
    %26 = tpu.matmul %23, %24, %cst_9 {dimension_numbers = #tpu.dot_dimension_numbers<[1], [1], [0], [0], [0, 0, 1, 0], [], []>} : vector<8x8xf32>, vector<8x8xf32>, vector<8x8xf32> -> vector<8x8xf32>
    %cst_10 = arith.constant 0.353553385 : f32
    %27 = vector.broadcast %cst_10 : f32 to vector<8x8xf32>
    %28 = arith.mulf %26, %27 : vector<8x8xf32>
    %cst_11 = arith.constant dense<0xFF800000> : vector<8xf32>
    %29 = vector.multi_reduction <maximumf>, %28, %cst_11 [1] : vector<8x8xf32> to vector<8xf32>
    %30 = vector.shape_cast %29 : vector<8xf32> to vector<8x1xf32>
    %31 = vector.broadcast %30 : vector<8x1xf32> to vector<8x8xf32>
    %32 = arith.subf %28, %31 : vector<8x8xf32>
    %33 = math.exp %32 : vector<8x8xf32>
    %cst_12 = arith.constant dense<0.000000e+00> : vector<8xf32>
    %34 = vector.multi_reduction <add>, %33, %cst_12 [1] : vector<8x8xf32> to vector<8xf32>
    %35 = vector.shape_cast %34 : vector<8xf32> to vector<8x1xf32>
    %36 = tpu.reciprocal %35 {approx = true} : vector<8x1xf32> -> vector<8x1xf32>
    %37 = vector.broadcast %36 : vector<8x1xf32> to vector<8x8xf32>
    %38 = arith.mulf %33, %37 : vector<8x8xf32>
    %cst_13 = arith.constant dense<0.000000e+00> : vector<8x8xf32>
    %39 = tpu.matmul %38, %25, %cst_13 {dimension_numbers = #tpu.dot_dimension_numbers<[1], [0], [0], [1], [0, 0, 1, 1], [], []>} : vector<8x8xf32>, vector<8x8xf32>, vector<8x8xf32> -> vector<8x8xf32>
    %40 = vector.extract_strided_slice %1 {offsets = [0, 16], sizes = [8, 8], strides = [1, 1]} : vector<8x32xf32> to vector<8x8xf32>
    %41 = vector.extract_strided_slice %4 {offsets = [0, 16], sizes = [8, 8], strides = [1, 1]} : vector<8x32xf32> to vector<8x8xf32>
    %42 = vector.extract_strided_slice %5 {offsets = [0, 16], sizes = [8, 8], strides = [1, 1]} : vector<8x32xf32> to vector<8x8xf32>
    %cst_14 = arith.constant dense<0.000000e+00> : vector<8x8xf32>
    %43 = tpu.matmul %40, %41, %cst_14 {dimension_numbers = #tpu.dot_dimension_numbers<[1], [1], [0], [0], [0, 0, 1, 0], [], []>} : vector<8x8xf32>, vector<8x8xf32>, vector<8x8xf32> -> vector<8x8xf32>
    %cst_15 = arith.constant 0.353553385 : f32
    %44 = vector.broadcast %cst_15 : f32 to vector<8x8xf32>
    %45 = arith.mulf %43, %44 : vector<8x8xf32>
    %cst_16 = arith.constant dense<0xFF800000> : vector<8xf32>
    %46 = vector.multi_reduction <maximumf>, %45, %cst_16 [1] : vector<8x8xf32> to vector<8xf32>
    %47 = vector.shape_cast %46 : vector<8xf32> to vector<8x1xf32>
    %48 = vector.broadcast %47 : vector<8x1xf32> to vector<8x8xf32>
    %49 = arith.subf %45, %48 : vector<8x8xf32>
    %50 = math.exp %49 : vector<8x8xf32>
    %cst_17 = arith.constant dense<0.000000e+00> : vector<8xf32>
    %51 = vector.multi_reduction <add>, %50, %cst_17 [1] : vector<8x8xf32> to vector<8xf32>
    %52 = vector.shape_cast %51 : vector<8xf32> to vector<8x1xf32>
    %53 = tpu.reciprocal %52 {approx = true} : vector<8x1xf32> -> vector<8x1xf32>
    %54 = vector.broadcast %53 : vector<8x1xf32> to vector<8x8xf32>
    %55 = arith.mulf %50, %54 : vector<8x8xf32>
    %cst_18 = arith.constant dense<0.000000e+00> : vector<8x8xf32>
    %56 = tpu.matmul %55, %42, %cst_18 {dimension_numbers = #tpu.dot_dimension_numbers<[1], [0], [0], [1], [0, 0, 1, 1], [], []>} : vector<8x8xf32>, vector<8x8xf32>, vector<8x8xf32> -> vector<8x8xf32>
    %57 = vector.extract_strided_slice %1 {offsets = [0, 24], sizes = [8, 8], strides = [1, 1]} : vector<8x32xf32> to vector<8x8xf32>
    %58 = vector.extract_strided_slice %4 {offsets = [0, 24], sizes = [8, 8], strides = [1, 1]} : vector<8x32xf32> to vector<8x8xf32>
    %59 = vector.extract_strided_slice %5 {offsets = [0, 24], sizes = [8, 8], strides = [1, 1]} : vector<8x32xf32> to vector<8x8xf32>
    %cst_19 = arith.constant dense<0.000000e+00> : vector<8x8xf32>
    %60 = tpu.matmul %57, %58, %cst_19 {dimension_numbers = #tpu.dot_dimension_numbers<[1], [1], [0], [0], [0, 0, 1, 0], [], []>} : vector<8x8xf32>, vector<8x8xf32>, vector<8x8xf32> -> vector<8x8xf32>
    %cst_20 = arith.constant 0.353553385 : f32
    %61 = vector.broadcast %cst_20 : f32 to vector<8x8xf32>
    %62 = arith.mulf %60, %61 : vector<8x8xf32>
    %cst_21 = arith.constant dense<0xFF800000> : vector<8xf32>
    %63 = vector.multi_reduction <maximumf>, %62, %cst_21 [1] : vector<8x8xf32> to vector<8xf32>
    %64 = vector.shape_cast %63 : vector<8xf32> to vector<8x1xf32>
    %65 = vector.broadcast %64 : vector<8x1xf32> to vector<8x8xf32>
    %66 = arith.subf %62, %65 : vector<8x8xf32>
    %67 = math.exp %66 : vector<8x8xf32>
    %cst_22 = arith.constant dense<0.000000e+00> : vector<8xf32>
    %68 = vector.multi_reduction <add>, %67, %cst_22 [1] : vector<8x8xf32> to vector<8xf32>
    %69 = vector.shape_cast %68 : vector<8xf32> to vector<8x1xf32>
    %70 = tpu.reciprocal %69 {approx = true} : vector<8x1xf32> -> vector<8x1xf32>
    %71 = vector.broadcast %70 : vector<8x1xf32> to vector<8x8xf32>
    %72 = arith.mulf %67, %71 : vector<8x8xf32>
    %cst_23 = arith.constant dense<0.000000e+00> : vector<8x8xf32>
    %73 = tpu.matmul %72, %59, %cst_23 {dimension_numbers = #tpu.dot_dimension_numbers<[1], [0], [0], [1], [0, 0, 1, 1], [], []>} : vector<8x8xf32>, vector<8x8xf32>, vector<8x8xf32> -> vector<8x8xf32>
    %74 = tpu.concatenate %22, %39, %56, %73 in 1 : vector<8x8xf32>, vector<8x8xf32>, vector<8x8xf32>, vector<8x8xf32> -> vector<8x32xf32>
    %c0_24 = arith.constant 0 : index
    %c0_25 = arith.constant 0 : index
    %c0_26 = arith.constant 0 : index
    %75 = vector.load %arg3[%c0_24, %c0_25, %c0_26] : memref<1x8x32xf32, #tpu.memory_space<vmem>>, vector<1x8x32xf32>
    %76 = vector.shape_cast %75 : vector<1x8x32xf32> to vector<8x32xf32>
    %77 = vector.shape_cast %74 : vector<8x32xf32> to vector<1x8x32xf32>
    tpu.vector_store %arg3[%c0_24, %c0_25, %c0_26], %77 {strides = array<i32>} : memref<1x8x32xf32, #tpu.memory_space<vmem>>, vector<1x8x32xf32>,
    return
  }
  func.func @transform_0(%arg0: i32) -> (i32, i32, i32) {
    %c0_i32 = arith.constant 0 : i32
    %c0_i32_0 = arith.constant 0 : i32
    %c0_i32_1 = arith.constant 0 : i32
    return %arg0, %c0_i32, %c0_i32_0 : i32, i32, i32
  }
  func.func @transform_1(%arg0: i32) -> (i32, i32, i32) {
    %c0_i32 = arith.constant 0 : i32
    %c0_i32_0 = arith.constant 0 : i32
    %c0_i32_1 = arith.constant 0 : i32
    return %arg0, %c0_i32, %c0_i32_0 : i32, i32, i32
  }
  func.func @transform_2(%arg0: i32) -> (i32, i32, i32) {
    %c0_i32 = arith.constant 0 : i32
    %c0_i32_0 = arith.constant 0 : i32
    %c0_i32_1 = arith.constant 0 : i32
    return %arg0, %c0_i32, %c0_i32_0 : i32, i32, i32
  }
}

</mosaic_0001>

<bundles_post_ra>
// kernel: _lambda_.43
= control target key start
LH: loop header
LB: loop body
LE: loop exit
PB: predicated region body
PF: predicated region fallthrough
CT: control target
= control target key end

     0   :  { %vm18_vm0 = vcmask 261120   ;;  %v164_v3 = vmov 0.0   ;;  %s220_s1 = inlined_call_operand.vmem [shape: f32[32,32], index: 1, kind: input, shape index: {}]   ;;  %s221_s0 = inlined_call_operand.vmem [shape: f32[16,32], index: 0, kind: input, shape index: {}]   ;;  %s222_s2 = inlined_call_operand.vmem [shape: f32[1,32], index: 2, kind: input, shape index: {}]   ;;  %s223_s3 = inlined_call_operand.vmem [shape: f32[16,32], index: 3, kind: output, shape index: {}]  }
   0x1   :  { %v23_v0 = vld [vmem:[%s220_s1] sm:$0xff]  ;;  %v24_v1 = vld [vmem:[%s220_s1 + $0x8] sm:$0xff]  ;;  %v25_v2 = vld [vmem:[%s220_s1 + $0x10] sm:$0xff]  ;;  %20 = vst.msk [vmem:[#allocation2 + $0x8] sm:$0xff] %vm18_vm0, %v164_v3 }
   0x2   :  { %19 = vst.msk [vmem:[#allocation2] sm:$0xff] %vm18_vm0, %v164_v3  ;;  %v155_v4 = vpack.c.bf16 %v24_v1, %v23_v0  ;;  %v26_v5 = vld [vmem:[%s220_s1 + $0x18] sm:$0xff]  ;;  %v21_v6 = vld [vmem:[%s221_s0] sm:$0xff]  ;;  %v22_v8 = vld [vmem:[%s221_s0 + $0x8] sm:$0xff] }
   0x3   :  { %v159_v7 = vpack.c.bf16 %v26_v5, %v25_v2  ;;  %152 = vmatprep.mubr.msk.f32.mxu0 %vm18_vm0, %v21_v6  ;;  %v137_v15 = vld [vmem:[%s222_s2] ss:$0 sm:$0xff] }
   0x4   :  { %156 = vmatprep.subr.bf16.mxu0 %v155_v4 }
   0x5   :  { %158 = vmatpush3.bf16.msra.mxu0 %v155_v4 }
   0x6   :  { %160 = vmatprep.subr.bf16.mxu0 %v159_v7 }
   0x8   :  { %v28_v9 = vld [vmem:[#allocation2 + $0x8] sm:$0xff] }
   0x9   :  { %162 = vmatpush3.bf16.msra.mxu0 %v159_v7  ;;  %v27_v10 = vld [vmem:[#allocation2] sm:$0xff] }
   0xc   :  { %153 = vmatmul.mubr.msk.f32.vlgmr.msra.gmra.mrb[0].mxu0 %vm18_vm0, %v22_v8 }
  0xdf   :  { %v154_v11 = vpop.f32.mrb[0].mxu0 }
  0xe0   :  { %v112_v12 = vadd.f32 %v154_v11, %v28_v9  ;;  %v102_v13 = vpop.f32.mrb[1].mxu0 }
  0xe1   :  { %v111_v14 = vadd.f32 %v102_v13, %v27_v10 }
  0xe2   :  { %114 = vst.msk [vmem:[#allocation2 + $0x8] sm:$0xff] %vm18_vm0, %v112_v12 }
  0xe3   :  { %113 = vst.msk [vmem:[#allocation2] sm:$0xff] %vm18_vm0, %v111_v14 }
  0xe9   :  { %v119_v16 = vld [vmem:[#allocation2 + $0x8] sm:$0xff] }
  0xea   :  { %v128_v17 = vadd.f32 %v137_v15, %v119_v16  ;;  %v118_v18 = vld [vmem:[#allocation2] sm:$0xff] }
  0xeb   :  { %v127_v19 = vadd.f32 %v137_v15, %v118_v18 }
  0xec   :  { %130 = vst.msk [vmem:[%s223_s3 + $0x8] sm:$0xff] %vm18_vm0, %v128_v17 }
  0xed   :  { %129 = vst.msk [vmem:[%s223_s3] sm:$0xff] %vm18_vm0, %v127_v19 }

// kernel: _lambda_.41
= control target key start
LH: loop header
LB: loop body
LE: loop exit
PB: predicated region body
PF: predicated region fallthrough
CT: control target
= control target key end

     0   :  { %vm29_vm0 = vcmask 261120   ;;  %vm18_vm1 = vcmask 785408   ;;  %v165_v3 = vmov 0.0   ;;  %s221_s1 = inlined_call_operand.vmem [shape: f32[32,96], index: 1, kind: input, shape index: {}]   ;;  %s222_s0 = inlined_call_operand.vmem [shape: f32[16,32], index: 0, kind: input, shape index: {}]   ;;  %s223_s2 = inlined_call_operand.vmem [shape: f32[1,96], index: 2, kind: input, shape index: {}]   ;;  %s224_s3 = inlined_call_operand.vmem [shape: f32[16,96], index: 3, kind: output, shape index: {}]  }
   0x1   :  { %v23_v0 = vld [vmem:[%s221_s1] sm:$0xff]  ;;  %v24_v1 = vld [vmem:[%s221_s1 + $0x8] sm:$0xff]  ;;  %v25_v2 = vld [vmem:[%s221_s1 + $0x10] sm:$0xff]  ;;  %20 = vst.msk [vmem:[#allocation2 + $0x8] sm:$0xff] %vm18_vm1, %v165_v3 }
   0x2   :  { %19 = vst.msk [vmem:[#allocation2] sm:$0xff] %vm18_vm1, %v165_v3  ;;  %v156_v4 = vpack.c.bf16 %v24_v1, %v23_v0  ;;  %v26_v5 = vld [vmem:[%s221_s1 + $0x18] sm:$0xff]  ;;  %v21_v6 = vld [vmem:[%s222_s0] sm:$0xff]  ;;  %v22_v8 = vld [vmem:[%s222_s0 + $0x8] sm:$0xff] }
   0x3   :  { %v160_v7 = vpack.c.bf16 %v26_v5, %v25_v2  ;;  %153 = vmatprep.mubr.msk.f32.mxu0 %vm29_vm0, %v21_v6  ;;  %v138_v15 = vld [vmem:[%s223_s2] ss:$0 sm:$0xff] }
   0x4   :  { %157 = vmatprep.subr.bf16.mxu0 %v156_v4 }
   0x5   :  { %159 = vmatpush3.bf16.msra.mxu0 %v156_v4 }
   0x6   :  { %161 = vmatprep.subr.bf16.mxu0 %v160_v7 }
   0x8   :  { %v28_v9 = vld [vmem:[#allocation2 + $0x8] sm:$0xff] }
   0x9   :  { %163 = vmatpush3.bf16.msra.mxu0 %v160_v7  ;;  %v27_v10 = vld [vmem:[#allocation2] sm:$0xff] }
   0xc   :  { %154 = vmatmul.mubr.msk.f32.vlgmr.msra.gmra.mrb[0].mxu0 %vm29_vm0, %v22_v8 }
  0xdf   :  { %v155_v11 = vpop.f32.mrb[0].mxu0 }
  0xe0   :  { %v112_v12 = vadd.f32 %v155_v11, %v28_v9  ;;  %v102_v13 = vpop.f32.mrb[1].mxu0 }
  0xe1   :  { %v111_v14 = vadd.f32 %v102_v13, %v27_v10 }
  0xe2   :  { %115 = vst.msk [vmem:[#allocation2 + $0x8] sm:$0xff] %vm18_vm1, %v112_v12 }
  0xe3   :  { %114 = vst.msk [vmem:[#allocation2] sm:$0xff] %vm18_vm1, %v111_v14 }
  0xe9   :  { %v120_v16 = vld [vmem:[#allocation2 + $0x8] sm:$0xff] }
  0xea   :  { %v129_v17 = vadd.f32 %v138_v15, %v120_v16  ;;  %v119_v18 = vld [vmem:[#allocation2] sm:$0xff] }
  0xeb   :  { %v128_v19 = vadd.f32 %v138_v15, %v119_v18 }
  0xec   :  { %131 = vst.msk [vmem:[%s224_s3 + $0x8] sm:$0xff] %vm18_vm1, %v129_v17 }
  0xed   :  { %130 = vst.msk [vmem:[%s224_s3] sm:$0xff] %vm18_vm1, %v128_v19 }

// kernel: _lambda_.40
= control target key start
LH: loop header
LB: loop body
LE: loop exit
PB: predicated region body
PF: predicated region fallthrough
CT: control target
= control target key end

     0   :  { %vm27_vm0 = vcmask 130048   ;;  %vm18_vm1 = vcmask 261120   ;;  %v153_v3 = vmov 0.0   ;;  %s201_s1 = inlined_call_operand.vmem [shape: f32[16,32], index: 1, kind: input, shape index: {}]   ;;  %s202_s0 = inlined_call_operand.vmem [shape: f32[16,16], index: 0, kind: input, shape index: {}]   ;;  %s203_s2 = inlined_call_operand.vmem [shape: f32[1,32], index: 2, kind: input, shape index: {}]   ;;  %s204_s3 = inlined_call_operand.vmem [shape: f32[16,32], index: 3, kind: output, shape index: {}]  }
   0x1   :  { %v23_v0 = vld [vmem:[%s201_s1] sm:$0xff]  ;;  %v24_v1 = vld [vmem:[%s201_s1 + $0x8] sm:$0xff]  ;;  %20 = vst.msk [vmem:[#allocation2 + $0x8] sm:$0xff] %vm18_vm1, %v153_v3  ;;  %19 = vst.msk [vmem:[#allocation2] sm:$0xff] %vm18_vm1, %v153_v3 }
   0x2   :  { %v21_v2 = vld [vmem:[%s202_s0] sm:$0xff]  ;;  %v148_v4 = vpack.c.bf16 %v24_v1, %v23_v0  ;;  %v22_v5 = vld [vmem:[%s202_s0 + $0x8] sm:$0xff] }
   0x3   :  { %145 = vmatprep.mubr.msk.f32.mxu0 %vm27_vm0, %v21_v2  ;;  %v136_v12 = vld [vmem:[%s203_s2] ss:$0 sm:$0xff] }
   0x4   :  { %149 = vmatprep.subr.bf16.mxu0 %v148_v4 }
   0x5   :  { %151 = vmatpush3.bf16.msra.mxu0 %v148_v4 }
   0x8   :  { %146 = vmatmul.mubr.msk.f32.vlgmr.msra.gmra.mrb[0].mxu0 %vm27_vm0, %v22_v5  ;;  %v26_v6 = vld [vmem:[#allocation2 + $0x8] sm:$0xff]  ;;  %v25_v7 = vld [vmem:[#allocation2] sm:$0xff] }
  0xdb   :  { %v147_v8 = vpop.f32.mrb[0].mxu0 }
  0xdc   :  { %v110_v9 = vadd.f32 %v147_v8, %v26_v6  ;;  %v100_v10 = vpop.f32.mrb[1].mxu0 }
  0xdd   :  { %v109_v11 = vadd.f32 %v100_v10, %v25_v7 }
  0xde   :  { %113 = vst.msk [vmem:[#allocation2 + $0x8] sm:$0xff] %vm18_vm1, %v110_v9 }
  0xdf   :  { %112 = vst.msk [vmem:[#allocation2] sm:$0xff] %vm18_vm1, %v109_v11 }
  0xe5   :  { %v118_v13 = vld [vmem:[#allocation2 + $0x8] sm:$0xff] }
  0xe6   :  { %v127_v14 = vadd.f32 %v136_v12, %v118_v13  ;;  %v117_v15 = vld [vmem:[#allocation2] sm:$0xff] }
  0xe7   :  { %v126_v16 = vadd.f32 %v136_v12, %v117_v15 }
  0xe8   :  { %129 = vst.msk [vmem:[%s204_s3 + $0x8] sm:$0xff] %vm18_vm1, %v127_v14 }
  0xe9   :  { %128 = vst.msk [vmem:[%s204_s3] sm:$0xff] %vm18_vm1, %v126_v16 }

// kernel: _lambda_.42
= control target key start
LH: loop header
LB: loop body
LE: loop exit
PB: predicated region body
PF: predicated region fallthrough
CT: control target
= control target key end

     0   :  { %s1000_s6 = smov 0   ;;  %s1086_s0 = inlined_call_operand.vmem [shape: f32[2,8,96], index: 0, kind: input, shape index: {}]   ;;  %s1087_s1 = inlined_call_operand.vmem [shape: f32[2,8,32], index: 1, kind: output, shape index: {}]  }
   0x1 LB: > { %s849_s7 = sadd.s32 4294967295, %s972_s6   ;;  %p853_p0 = scmp.ge.s32.totalorder %s972_s6, 1  ;;  %s972_s6 = sphi %s1000_s6, %s11_s6  }
   0x2   : > { %p86_p1 = scmp.lt.s32.totalorder %s972_s6, 3 }
   0x4   : > { %p87_p2 = pnand %p853_p0, %p86_p1 }
   0x5   : > { %p104_p3 = scmp.lt.s32.totalorder (!%p87_p2), %s849_s7, 1  ;;  %v974_v0 = vmov (!%p87_p2), 0.0   ;;  %vm975_vm0 = vmmov (!%p87_p2), 0   ;;  %s976_s12 = smov (!%p87_p2), 96   ;;  %vm116_vm1 = vcmask (!%p87_p2), 64512   ;;  %vm790_vm2 = vcmask (!%p87_p2), 130048  }
   0x6   : > { %90 = sbr.rel (%p87_p2) target bundleno = 1532 (0x5fc), region = 24  ;;  %886 = vmatprep.subr.mxu0 (!%p87_p2), %v974_v0  ;;  %888 = vmatprep.mubr.msk.f32.mxu0 (!%p87_p2), %vm975_vm0, %v974_v0  ;;  %s977_s13 = smov (!%p87_p2), 64   ;;  %vm792_vm3 = vcmask (!%p87_p2), 195584   ;;  %vm794_vm4 = vcmask (!%p87_p2), 261120  }
   0x7   : > { %891 = vmatprep.subr.mxu1 (!%p87_p2), %v974_v0  ;;  %893 = vmatprep.mubr.msk.f32.mxu1 (!%p87_p2), %vm975_vm0, %v974_v0  ;;  %s978_s14 = smov (!%p87_p2), 88   ;;  %s979_s15 = smov (!%p87_p2), 120  }
   0x8   : > { %s980_s16 = smov (!%p87_p2), 80   ;;  %s981_s17 = smov (!%p87_p2), 72  }
   0x9   : > { %s982_s18 = smov (!%p87_p2), 112   ;;  %s983_s19 = smov (!%p87_p2), 104  }
   0xa   : > { %s984_s20 = smov (!%p87_p2), 56   ;;  %s985_s21 = smov (!%p87_p2), 40  }
   0xb   : > { %s986_s22 = smov (!%p87_p2), 48   ;;  %s987_s23 = smov (!%p87_p2), 8  }
   0xc   : > { %s988_s24 = smov (!%p87_p2), 16   ;;  %s989_s25 = smov (!%p87_p2), 24  }
   0xd   : > { %s1089_s7 = smov (!%p104_p3, %s849_s7), 1 }
   0xe   : > { %s854_s8 = sshll.u32 %s1089_s7, 3 }
   0xf   : > { %s107_s11 = scalar_lea.vmem %s1086_s0, %s854_s8  ;;  %s111_s28 = scalar_lea.vmem %s1087_s1, %s854_s8 }
  0x10   : > { %v1022_v1 = vld [vmem:[%s107_s11] sm:$0xff] }
  0x11   : > { %114 = vrot.lane.b32.xlu0 %v1022_v1, %s976_s12  ;;  %203 = vrot.lane.b32.xlu1 %v1022_v1, %s977_s13 }
  0x15   : > { %281 = vrot.lane.b32.xlu1 %v1022_v1, %s978_s14 }
  0x19   : > { %279 = vrot.lane.b32.xlu1 %v1022_v1, %s979_s15 }
  0x1d   : > { %447 = vrot.lane.b32.xlu1 %v1022_v1, %s980_s16 }
  0x83   : > { %v115_v2 = vpop.permute.xlu0 %114  ;;  %v204_v7 = vpop.permute.xlu1 %203 }
  0x84   : > { %887 = vmatpush3.xpose.msk.msra.mxu0 %vm116_vm1, %v115_v2  ;;  %892 = vmatpush3.msra.mxu1 %v204_v7 }
  0x85   : > { %901 = vmatprep.subr.mxu0 %v974_v0  ;;  %896 = vmatprep.subr.mxu1 %v974_v0 }
  0x87   : > { %889 = vmatmul.mubr.msk.f32.vlgmr.msra.gmra.mrb[0].mxu0 %vm116_vm1, %v1022_v1  ;;  %v282_v13 = vpop.permute.xlu1 %281 }
  0x88   : > { %903 = vmatprep.mubr.msk.f32.mxu0 %vm975_vm0, %v974_v0 }
  0x8b   : > { %v280_v14 = vpop.permute.xlu1 %279 }
  0x8f   : > { %v448_v15 = vpop.permute.xlu1 %447 }
 0x15a   : > { %v187_v3 = vpop.f32.mrb[0].mxu0 }
 0x15b   : > { %v191_v4 = vmul.f32 0.35355338, %v187_v3  ;;  %v890_v5 = vpop.f32.mrb[1].mxu0 }
 0x15d   : > { %v192_v6 = vsel %vm116_vm1, %v191_v4, -inf }
 0x15e   : > { %193 = vmax.xlane.f32.xlu0 %v192_v6 }
 0x174   : > { %613 = vrot.lane.b32.xlu0 %v1022_v1, %s981_s17 }
 0x1eb   : > { %v194_v8 = vpop.xlane.xlu0 %193 }
 0x1ec   : > { %v195_v9 = vsub.f32 %v191_v4, %v194_v8 }
 0x1ee   : > { %v196_v10 = vmul.f32 1.442695, %v195_v9 }
 0x1ef   : > { %v614_v20 = vpop.permute.xlu0 %613 }
 0x1f0   : > { %950 = vpow2.f32 %v196_v10 }
 0x1fa   : > { %v951_v11 = vpop.eup %950 }
 0x1fb   : > { %v198_v12 = vsel %vm116_vm1, %v951_v11, 0.0 }
 0x1fc   : > { %199 = vadd.xlane.f32.xlu1 %v198_v12 }
 0x20d   : > { %445 = vrot.lane.b32.xlu1 %v1022_v1, %s982_s18 }
 0x211   : > { %611 = vrot.lane.b32.xlu1 %v1022_v1, %s983_s19 }
 0x289   : > { %v200_v16 = vpop.xlane.xlu1 %199 }
 0x28a   : > { %952 = vrcp.f32 %v200_v16 }
 0x28d   : > { %v446_v19 = vpop.permute.xlu1 %445 }
 0x291   : > { %v612_v21 = vpop.permute.xlu1 %611 }
 0x294   : > { %v953_v17 = vpop.eup %952 }
 0x295   : > { %v202_v18 = vmul.f32 %v953_v17, %v951_v11 }
 0x297   : > { %894 = vmatmul.mubr.msk.f32.vlgmr.msra.gmra.mrb[0].mxu1 %vm116_vm1, %v202_v18 }
 0x298   : > { %897 = vmatpush3.xpose.msk.msra.mxu1 %vm116_vm1, %v282_v13  ;;  %898 = vmatprep.mubr.msk.f32.mxu1 %vm975_vm0, %v974_v0 }
 0x299   : > { %906 = vmatprep.subr.mxu1 %v974_v0 }
 0x29b   : > { %899 = vmatmul.mubr.msk.f32.vlgmr.msra.gmra.mrb[2].mxu1 %vm116_vm1, %v280_v14 }
 0x29c   : > { %907 = vmatpush3.xpose.msk.msra.mxu1 %vm116_vm1, %v448_v15  ;;  %908 = vmatprep.mubr.msk.f32.mxu1 %vm975_vm0, %v974_v0 }
 0x29d   : > { %916 = vmatprep.subr.mxu1 %v974_v0 }
 0x29f   : > { %909 = vmatmul.mubr.msk.f32.vlgmr.msra.gmra.mrb[4].mxu1 %vm116_vm1, %v446_v19 }
 0x2a0   : > { %917 = vmatpush3.xpose.msk.msra.mxu1 %vm116_vm1, %v614_v20  ;;  %918 = vmatprep.mubr.msk.f32.mxu1 %vm975_vm0, %v974_v0 }
 0x2a3   : > { %919 = vmatmul.mubr.msk.f32.vlgmr.msra.gmra.mrb[6].mxu1 %vm116_vm1, %v612_v21 }
 0x36a   : > { %v1056_v22 = vpop.f32.mrb[0].mxu1 }
 0x36b   : > { %v895_v23 = vpop.f32.mrb[1].mxu1 }
 0x36e   : > { %v353_v24 = vpop.f32.mrb[2].mxu1 }
 0x36f   : > { %v357_v25 = vmul.f32 0.35355338, %v353_v24  ;;  %v900_v26 = vpop.f32.mrb[3].mxu1 }
 0x371   : > { %v358_v27 = vsel %vm116_vm1, %v357_v25, -inf }
 0x372   : > { %359 = vmax.xlane.f32.xlu1 %v358_v27  ;;  %v519_v28 = vpop.f32.mrb[4].mxu1 }
 0x373   : > { %v523_v29 = vmul.f32 0.35355338, %v519_v28  ;;  %v910_v30 = vpop.f32.mrb[5].mxu1 }
 0x375   : > { %v524_v31 = vsel %vm116_vm1, %v523_v29, -inf }
 0x376   : > { %525 = vmax.xlane.f32.xlu0 %v524_v31  ;;  %v685_v32 = vpop.f32.mrb[6].mxu1 }
 0x377   : > { %v689_v33 = vmul.f32 0.35355338, %v685_v32  ;;  %v920_v34 = vpop.f32.mrb[7].mxu1 }
 0x379   : > { %v690_v35 = vsel %vm116_vm1, %v689_v33, -inf }
 0x37a   : > { %691 = vmax.xlane.f32.xlu1 %v690_v35 }
 0x38b   : > { %369 = vrot.lane.b32.xlu1 %v1022_v1, %s984_s20 }
 0x3ff   : > { %v360_v36 = vpop.xlane.xlu1 %359 }
 0x400   : > { %v361_v37 = vsub.f32 %v357_v25, %v360_v36 }
 0x402   : > { %v362_v38 = vmul.f32 1.442695, %v361_v37 }
 0x403   : > { %v526_v39 = vpop.xlane.xlu0 %525 }
 0x404   : > { %954 = vpow2.f32 %v362_v38  ;;  %v527_v40 = vsub.f32 %v523_v29, %v526_v39 }
 0x406   : > { %v528_v41 = vmul.f32 1.442695, %v527_v40 }
 0x407   : > { %v692_v42 = vpop.xlane.xlu1 %691 }
 0x408   : > { %956 = vpow2.f32 %v528_v41  ;;  %v693_v43 = vsub.f32 %v689_v33, %v692_v42 }
 0x40a   : > { %v694_v44 = vmul.f32 1.442695, %v693_v43 }
 0x40b   : > { %v370_v45 = vpop.permute.xlu1 %369 }
 0x40c   : > { %958 = vpow2.f32 %v694_v44  ;;  %902 = vmatpush3.msra.mxu0 %v370_v45 }
 0x40d   : > { %911 = vmatprep.subr.mxu0 %v974_v0 }
 0x40e   : > { %v955_v46 = vpop.eup %954 }
 0x40f   : > { %v364_v47 = vsel %vm116_vm1, %v955_v46, 0.0 }
 0x410   : > { %365 = vadd.xlane.f32.xlu1 %v364_v47 }
 0x412   : > { %v957_v48 = vpop.eup %956 }
 0x413   : > { %v530_v49 = vsel %vm116_vm1, %v957_v48, 0.0 }
 0x414   : > { %531 = vadd.xlane.f32.xlu1 %v530_v49 }
 0x416   : > { %v959_v50 = vpop.eup %958 }
 0x417   : > { %v696_v51 = vsel %vm116_vm1, %v959_v50, 0.0 }
 0x418   : > { %697 = vadd.xlane.f32.xlu0 %v696_v51 }
 0x425   : > { %701 = vrot.lane.b32.xlu1 %v1022_v1, %s985_s21 }
 0x42e   : > { %535 = vrot.lane.b32.xlu0 %v1022_v1, %s986_s22 }
 0x49d   : > { %v366_v52 = vpop.xlane.xlu1 %365 }
 0x49e   : > { %960 = vrcp.f32 %v366_v52 }
 0x4a1   : > { %v532_v53 = vpop.xlane.xlu1 %531 }
 0x4a2   : > { %962 = vrcp.f32 %v532_v53 }
 0x4a5   : > { %v698_v54 = vpop.xlane.xlu0 %697  ;;  %v702_v60 = vpop.permute.xlu1 %701 }
 0x4a6   : > { %964 = vrcp.f32 %v698_v54 }
 0x4a8   : > { %v961_v55 = vpop.eup %960 }
 0x4a9   : > { %v368_v56 = vmul.f32 %v961_v55, %v955_v46  ;;  %v536_v57 = vpop.permute.xlu0 %535 }
 0x4ab   : > { %904 = vmatmul.mubr.msk.f32.vlgmr.msra.gmra.mrb[2].mxu0 %vm116_vm1, %v368_v56 }
 0x4ac   : > { %v963_v58 = vpop.eup %962  ;;  %912 = vmatpush3.msra.mxu0 %v536_v57  ;;  %913 = vmatprep.mubr.msk.f32.mxu0 %vm975_vm0, %v974_v0 }
 0x4ad   : > { %v534_v59 = vmul.f32 %v963_v58, %v957_v48  ;;  %921 = vmatprep.subr.mxu0 %v974_v0 }
 0x4af   : > { %914 = vmatmul.mubr.msk.f32.vlgmr.msra.gmra.mrb[4].mxu0 %vm116_vm1, %v534_v59 }
 0x4b0   : > { %v965_v61 = vpop.eup %964  ;;  %922 = vmatpush3.msra.mxu0 %v702_v60  ;;  %923 = vmatprep.mubr.msk.f32.mxu0 %vm975_vm0, %v974_v0 }
 0x4b1   : > { %v700_v62 = vmul.f32 %v965_v61, %v959_v50 }
 0x4b3   : > { %924 = vmatmul.mubr.msk.f32.vlgmr.msra.gmra.mrb[6].mxu0 %vm116_vm1, %v700_v62 }
 0x57e   : > { %v441_v63 = vpop.f32.mrb[2].mxu0 }
 0x57f   : > { %778 = vrot.lane.b32.xlu1 %v441_v63, %s987_s23  ;;  %v905_v1 = vpop.f32.mrb[3].mxu0 }
 0x582   : > { %v607_v2 = vpop.f32.mrb[4].mxu0 }
 0x583   : > { %782 = vrot.lane.b32.xlu0 %v607_v2, %s988_s24  ;;  %v915_v3 = vpop.f32.mrb[5].mxu0 }
 0x586   : > { %v773_v4 = vpop.f32.mrb[6].mxu0 }
 0x587   : > { %786 = vrot.lane.b32.xlu1 %v773_v4, %s989_s25  ;;  %v925_v5 = vpop.f32.mrb[7].mxu0 }
 0x5f1   : > { %v779_v6 = vpop.permute.xlu1 %778 }
 0x5f2   : > { %v789_v0 = vsel %vm116_vm1, %v1056_v22, %v779_v6 }
 0x5f5   : > { %v783_v7 = vpop.permute.xlu0 %782 }
 0x5f6   : > { %v791_v8 = vsel %vm790_vm2, %v789_v0, %v783_v7 }
 0x5f9   : > { %v787_v9 = vpop.permute.xlu1 %786 }
 0x5fa   : > { %v793_v10 = vsel %vm792_vm3, %v791_v8, %v787_v9 }
 0x5fb   : > { %795 = vst.msk [vmem:[%s111_s28] sm:$0xff] %vm794_vm4, %v793_v10 }
 0x5fc PF: > { %s11_s6 = sadd.s32 1, %s972_s6  }
 0x5fd   : > { %p8_p4 = scmp.ge.s32.totalorder %s11_s6, 4  }
 0x5ff   :  { %10 = sbr.rel (!%p8_p4) target bundleno = 1 (0x1), region = 54 }

// kernel: _lambda_.44
= control target key start
LH: loop header
LB: loop body
LE: loop exit
PB: predicated region body
PF: predicated region fallthrough
CT: control target
= control target key end

     0   :  { %vm23_vm0 = vcmask 261120   ;;  %s136_s0 = inlined_call_operand.vmem [shape: f32[16,32], index: 0, kind: input, shape index: {}]   ;;  %s137_s1 = inlined_call_operand.vmem [shape: f32[16,32], index: 1, kind: input, shape index: {}]   ;;  %s138_s2 = inlined_call_operand.vmem [shape: f32[1,32], index: 2, kind: input, shape index: {}]   ;;  %s139_s3 = inlined_call_operand.vmem [shape: f32[1,32], index: 3, kind: input, shape index: {}]   ;;  %s140_s4 = inlined_call_operand.vmem [shape: f32[16,32], index: 4, kind: output, shape index: {}]  }
   0x1   :  { %v17_v0 = vld [vmem:[%s136_s0] sm:$0xff]  ;;  %v18_v2 = vld [vmem:[%s136_s0 + $0x8] sm:$0xff] }
   0x2   :  { %v19_v1 = vld [vmem:[%s137_s1] sm:$0xff]  ;;  %v20_v4 = vld [vmem:[%s137_s1 + $0x8] sm:$0xff] }
   0x3   :  { %v21_v3 = vadd.f32 %v19_v1, %v17_v0  ;;  %v22_v5 = vadd.f32 %v20_v4, %v18_v2  ;;  %v75_v25 = vld [vmem:[%s138_s2] ss:$0 sm:$0xff] }
   0x4   :  { %v76_v27 = vld [vmem:[%s139_s3] ss:$0 sm:$0xff] }
   0x5   :  { %v24_v6 = vsel %vm23_vm0, %v21_v3, 0.0  ;;  %v27_v7 = vsel %vm23_vm0, %v22_v5, 0.0 }
   0x6   :  { %25 = vadd.xlane.f32.xlu0 %v24_v6 }
   0xa   :  { %28 = vadd.xlane.f32.xlu0 %v27_v7 }
  0x93   :  { %v26_v8 = vpop.xlane.xlu0 %25 }
  0x94   :  { %v31_v9 = vmul.f32 0.03125, %v26_v8 }
  0x96   :  { %v33_v10 = vsub.f32 %v21_v3, %v31_v9 }
  0x97   :  { %v29_v11 = vpop.xlane.xlu0 %28 }
  0x98   :  { %v32_v12 = vmul.f32 0.03125, %v29_v11  ;;  %v35_v13 = vmul.f32 %v33_v10, %v33_v10 }
  0x9a   :  { %v34_v14 = vsub.f32 %v22_v5, %v32_v12  ;;  %v37_v15 = vsel %vm23_vm0, %v35_v13, 0.0 }
  0x9b   :  { %38 = vadd.xlane.f32.xlu1 %v37_v15 }
  0x9c   :  { %v36_v16 = vmul.f32 %v34_v14, %v34_v14 }
  0x9e   :  { %v40_v17 = vsel %vm23_vm0, %v36_v16, 0.0 }
  0x9f   :  { %41 = vadd.xlane.f32.xlu1 %v40_v17 }
 0x128   :  { %v39_v18 = vpop.xlane.xlu1 %38 }
 0x129   :  { %v43_v19 = vmul.f32 0.03125, %v39_v18 }
 0x12b   :  { %v45_v20 = vadd.f32 1e-05, %v43_v19 }
 0x12c   :  { %v42_v21 = vpop.xlane.xlu1 %41 }
 0x12d   :  { %77 = vrsqrt.f32 %v45_v20  ;;  %v44_v22 = vmul.f32 0.03125, %v42_v21 }
 0x12f   :  { %v46_v23 = vadd.f32 1e-05, %v44_v22 }
 0x131   :  { %79 = vrsqrt.f32 %v46_v23 }
 0x137   :  { %v78_v24 = vpop.eup %77 }
 0x138   :  { %v49_v26 = vmul.f32 %v78_v24, %v33_v10 }
 0x13a   :  { %v58_v28 = vmul.f32 %v75_v25, %v49_v26 }
 0x13b   :  { %v80_v29 = vpop.eup %79 }
 0x13c   :  { %v67_v30 = vadd.f32 %v76_v27, %v58_v28  ;;  %v50_v31 = vmul.f32 %v80_v29, %v34_v14 }
 0x13e   :  { %69 = vst.msk [vmem:[%s140_s4] sm:$0xff] %vm23_vm0, %v67_v30  ;;  %v59_v32 = vmul.f32 %v75_v25, %v50_v31 }
 0x140   :  { %v68_v33 = vadd.f32 %v76_v27, %v59_v32 }
 0x142   :  { %70 = vst.msk [vmem:[%s140_s4 + $0x8] sm:$0xff] %vm23_vm0, %v68_v33 }

// kernel: _lambda_.45
= control target key start
LH: loop header
LB: loop body
LE: loop exit
PB: predicated region body
PF: predicated region fallthrough
CT: control target
= control target key end

     0   :  { %vm29_vm0 = vcmask 261120   ;;  %vm18_vm1 = vcmask 523264   ;;  %v167_v3 = vmov 0.0   ;;  %s223_s1 = inlined_call_operand.vmem [shape: f32[32,64], index: 1, kind: input, shape index: {}]   ;;  %s224_s0 = inlined_call_operand.vmem [shape: f32[16,32], index: 0, kind: input, shape index: {}]   ;;  %s225_s2 = inlined_call_operand.vmem [shape: f32[1,64], index: 2, kind: input, shape index: {}]   ;;  %s226_s3 = inlined_call_operand.vmem [shape: f32[16,64], index: 3, kind: output, shape index: {}]  }
   0x1   :  { %v23_v0 = vld [vmem:[%s223_s1] sm:$0xff]  ;;  %v24_v1 = vld [vmem:[%s223_s1 + $0x8] sm:$0xff]  ;;  %v25_v2 = vld [vmem:[%s223_s1 + $0x10] sm:$0xff]  ;;  %20 = vst.msk [vmem:[#allocation2 + $0x8] sm:$0xff] %vm18_vm1, %v167_v3 }
   0x2   :  { %19 = vst.msk [vmem:[#allocation2] sm:$0xff] %vm18_vm1, %v167_v3  ;;  %v158_v4 = vpack.c.bf16 %v24_v1, %v23_v0  ;;  %v26_v5 = vld [vmem:[%s223_s1 + $0x18] sm:$0xff]  ;;  %v21_v6 = vld [vmem:[%s224_s0] sm:$0xff]  ;;  %v22_v8 = vld [vmem:[%s224_s0 + $0x8] sm:$0xff] }
   0x3   :  { %v162_v7 = vpack.c.bf16 %v26_v5, %v25_v2  ;;  %155 = vmatprep.mubr.msk.f32.mxu0 %vm29_vm0, %v21_v6  ;;  %v140_v15 = vld [vmem:[%s225_s2] ss:$0 sm:$0xff] }
   0x4   :  { %159 = vmatprep.subr.bf16.mxu0 %v158_v4 }
   0x5   :  { %161 = vmatpush3.bf16.msra.mxu0 %v158_v4 }
   0x6   :  { %163 = vmatprep.subr.bf16.mxu0 %v162_v7 }
   0x8   :  { %v28_v9 = vld [vmem:[#allocation2 + $0x8] sm:$0xff] }
   0x9   :  { %165 = vmatpush3.bf16.msra.mxu0 %v162_v7  ;;  %v27_v10 = vld [vmem:[#allocation2] sm:$0xff] }
   0xc   :  { %156 = vmatmul.mubr.msk.f32.vlgmr.msra.gmra.mrb[0].mxu0 %vm29_vm0, %v22_v8 }
  0xdf   :  { %v157_v11 = vpop.f32.mrb[0].mxu0 }
  0xe0   :  { %v112_v12 = vadd.f32 %v157_v11, %v28_v9  ;;  %v102_v13 = vpop.f32.mrb[1].mxu0 }
  0xe1   :  { %v111_v14 = vadd.f32 %v102_v13, %v27_v10 }
  0xe2   :  { %115 = vst.msk [vmem:[#allocation2 + $0x8] sm:$0xff] %vm18_vm1, %v112_v12 }
  0xe3   :  { %114 = vst.msk [vmem:[#allocation2] sm:$0xff] %vm18_vm1, %v111_v14 }
  0xe9   :  { %v120_v16 = vld [vmem:[#allocation2 + $0x8] sm:$0xff] }
  0xea   :  { %v129_v17 = vadd.f32 %v140_v15, %v120_v16  ;;  %v119_v18 = vld [vmem:[#allocation2] sm:$0xff] }
  0xeb   :  { %v128_v19 = vadd.f32 %v140_v15, %v119_v18 }
  0xec   :  { %v131_v20 = vmax.f32 %v129_v17, 0.0 }
  0xed   :  { %v130_v21 = vmax.f32 %v128_v19, 0.0 }
  0xee   :  { %133 = vst.msk [vmem:[%s226_s3 + $0x8] sm:$0xff] %vm18_vm1, %v131_v20 }
  0xef   :  { %132 = vst.msk [vmem:[%s226_s3] sm:$0xff] %vm18_vm1, %v130_v21 }

// kernel: _lambda_.46
= control target key start
LH: loop header
LB: loop body
LE: loop exit
PB: predicated region body
PF: predicated region fallthrough
CT: control target
= control target key end

     0   :  { %vm18_vm0 = vcmask 261120   ;;  %vm33_vm1 = vcmask 523264   ;;  %v189_v3 = vmov 0.0   ;;  %s257_s1 = inlined_call_operand.vmem [shape: f32[64,32], index: 1, kind: input, shape index: {}]   ;;  %s258_s0 = inlined_call_operand.vmem [shape: f32[16,64], index: 0, kind: input, shape index: {}]   ;;  %s259_s2 = inlined_call_operand.vmem [shape: f32[1,32], index: 2, kind: input, shape index: {}]   ;;  %s260_s3 = inlined_call_operand.vmem [shape: f32[16,32], index: 3, kind: output, shape index: {}]  }
   0x1   :  { %v23_v0 = vld [vmem:[%s257_s1] sm:$0xff]  ;;  %v24_v1 = vld [vmem:[%s257_s1 + $0x8] sm:$0xff]  ;;  %v25_v2 = vld [vmem:[%s257_s1 + $0x10] sm:$0xff]  ;;  %20 = vst.msk [vmem:[#allocation2 + $0x8] sm:$0xff] %vm18_vm0, %v189_v3 }
   0x2   :  { %19 = vst.msk [vmem:[#allocation2] sm:$0xff] %vm18_vm0, %v189_v3  ;;  %v172_v4 = vpack.c.bf16 %v24_v1, %v23_v0  ;;  %v26_v5 = vld [vmem:[%s257_s1 + $0x18] sm:$0xff]  ;;  %v27_v7 = vld [vmem:[%s257_s1 + $0x20] sm:$0xff]  ;;  %v28_v8 = vld [vmem:[%s257_s1 + $0x28] sm:$0xff] }
   0x3   :  { %v176_v6 = vpack.c.bf16 %v26_v5, %v25_v2  ;;  %v21_v9 = vld [vmem:[%s258_s0] sm:$0xff]  ;;  %v180_v10 = vpack.c.bf16 %v28_v8, %v27_v7  ;;  %v29_v11 = vld [vmem:[%s257_s1 + $0x30] sm:$0xff]  ;;  %v30_v12 = vld [vmem:[%s257_s1 + $0x38] sm:$0xff] }
   0x4   :  { %173 = vmatprep.subr.bf16.mxu0 %v172_v4  ;;  %169 = vmatprep.mubr.msk.f32.mxu0 %vm33_vm1, %v21_v9  ;;  %v184_v13 = vpack.c.bf16 %v30_v12, %v29_v11  ;;  %v22_v14 = vld [vmem:[%s258_s0 + $0x8] sm:$0xff]  ;;  %v142_v21 = vld [vmem:[%s259_s2] ss:$0 sm:$0xff] }
   0x5   :  { %175 = vmatpush3.bf16.msra.mxu0 %v172_v4 }
   0x6   :  { %177 = vmatprep.subr.bf16.mxu0 %v176_v6 }
   0x8   :  { %v32_v15 = vld [vmem:[#allocation2 + $0x8] sm:$0xff] }
   0x9   :  { %179 = vmatpush3.bf16.msra.mxu0 %v176_v6  ;;  %v31_v16 = vld [vmem:[#allocation2] sm:$0xff] }
   0xa   :  { %181 = vmatprep.subr.bf16.mxu0 %v180_v10 }
   0xd   :  { %183 = vmatpush3.bf16.msra.mxu0 %v180_v10 }
   0xe   :  { %185 = vmatprep.subr.bf16.mxu0 %v184_v13 }
  0x11   :  { %187 = vmatpush3.bf16.msra.mxu0 %v184_v13 }
  0x14   :  { %170 = vmatmul.mubr.msk.f32.vlgmr.msra.gmra.mrb[0].mxu0 %vm33_vm1, %v22_v14 }
  0xe7   :  { %v171_v17 = vpop.f32.mrb[0].mxu0 }
  0xe8   :  { %v116_v18 = vadd.f32 %v171_v17, %v32_v15  ;;  %v106_v19 = vpop.f32.mrb[1].mxu0 }
  0xe9   :  { %v115_v20 = vadd.f32 %v106_v19, %v31_v16 }
  0xea   :  { %119 = vst.msk [vmem:[#allocation2 + $0x8] sm:$0xff] %vm18_vm0, %v116_v18 }
  0xeb   :  { %118 = vst.msk [vmem:[#allocation2] sm:$0xff] %vm18_vm0, %v115_v20 }
  0xf1   :  { %v124_v22 = vld [vmem:[#allocation2 + $0x8] sm:$0xff] }
  0xf2   :  { %v133_v23 = vadd.f32 %v142_v21, %v124_v22  ;;  %v123_v24 = vld [vmem:[#allocation2] sm:$0xff] }
  0xf3   :  { %v132_v25 = vadd.f32 %v142_v21, %v123_v24 }
  0xf4   :  { %135 = vst.msk [vmem:[%s260_s3 + $0x8] sm:$0xff] %vm18_vm0, %v133_v23 }
  0xf5   :  { %134 = vst.msk [vmem:[%s260_s3] sm:$0xff] %vm18_vm0, %v132_v25 }

// kernel: _lambda_.60
= control target key start
LH: loop header
LB: loop body
LE: loop exit
PB: predicated region body
PF: predicated region fallthrough
CT: control target
= control target key end

     0   :  { %vm29_vm0 = vcmask 261120   ;;  %vm18_vm1 = vcmask 523264   ;;  %v165_v3 = vmov 0.0   ;;  %s221_s1 = inlined_call_operand.vmem [shape: f32[32,64], index: 1, kind: input, shape index: {}]   ;;  %s222_s0 = inlined_call_operand.vmem [shape: f32[16,32], index: 0, kind: input, shape index: {}]   ;;  %s223_s2 = inlined_call_operand.vmem [shape: f32[1,64], index: 2, kind: input, shape index: {}]   ;;  %s224_s3 = inlined_call_operand.vmem [shape: f32[16,64], index: 3, kind: output, shape index: {}]  }
   0x1   :  { %v23_v0 = vld [vmem:[%s221_s1] sm:$0xff]  ;;  %v24_v1 = vld [vmem:[%s221_s1 + $0x8] sm:$0xff]  ;;  %v25_v2 = vld [vmem:[%s221_s1 + $0x10] sm:$0xff]  ;;  %20 = vst.msk [vmem:[#allocation2 + $0x8] sm:$0xff] %vm18_vm1, %v165_v3 }
   0x2   :  { %19 = vst.msk [vmem:[#allocation2] sm:$0xff] %vm18_vm1, %v165_v3  ;;  %v156_v4 = vpack.c.bf16 %v24_v1, %v23_v0  ;;  %v26_v5 = vld [vmem:[%s221_s1 + $0x18] sm:$0xff]  ;;  %v21_v6 = vld [vmem:[%s222_s0] sm:$0xff]  ;;  %v22_v8 = vld [vmem:[%s222_s0 + $0x8] sm:$0xff] }
   0x3   :  { %v160_v7 = vpack.c.bf16 %v26_v5, %v25_v2  ;;  %153 = vmatprep.mubr.msk.f32.mxu0 %vm29_vm0, %v21_v6  ;;  %v138_v15 = vld [vmem:[%s223_s2] ss:$0 sm:$0xff] }
   0x4   :  { %157 = vmatprep.subr.bf16.mxu0 %v156_v4 }
   0x5   :  { %159 = vmatpush3.bf16.msra.mxu0 %v156_v4 }
   0x6   :  { %161 = vmatprep.subr.bf16.mxu0 %v160_v7 }
   0x8   :  { %v28_v9 = vld [vmem:[#allocation2 + $0x8] sm:$0xff] }
   0x9   :  { %163 = vmatpush3.bf16.msra.mxu0 %v160_v7  ;;  %v27_v10 = vld [vmem:[#allocation2] sm:$0xff] }
   0xc   :  { %154 = vmatmul.mubr.msk.f32.vlgmr.msra.gmra.mrb[0].mxu0 %vm29_vm0, %v22_v8 }
  0xdf   :  { %v155_v11 = vpop.f32.mrb[0].mxu0 }
  0xe0   :  { %v112_v12 = vadd.f32 %v155_v11, %v28_v9  ;;  %v102_v13 = vpop.f32.mrb[1].mxu0 }
  0xe1   :  { %v111_v14 = vadd.f32 %v102_v13, %v27_v10 }
  0xe2   :  { %115 = vst.msk [vmem:[#allocation2 + $0x8] sm:$0xff] %vm18_vm1, %v112_v12 }
  0xe3   :  { %114 = vst.msk [vmem:[#allocation2] sm:$0xff] %vm18_vm1, %v111_v14 }
  0xe9   :  { %v120_v16 = vld [vmem:[#allocation2 + $0x8] sm:$0xff] }
  0xea   :  { %v129_v17 = vadd.f32 %v138_v15, %v120_v16  ;;  %v119_v18 = vld [vmem:[#allocation2] sm:$0xff] }
  0xeb   :  { %v128_v19 = vadd.f32 %v138_v15, %v119_v18 }
  0xec   :  { %131 = vst.msk [vmem:[%s224_s3 + $0x8] sm:$0xff] %vm18_vm1, %v129_v17 }
  0xed   :  { %130 = vst.msk [vmem:[%s224_s3] sm:$0xff] %vm18_vm1, %v128_v19 }

// kernel: _lambda_.79
= control target key start
LH: loop header
LB: loop body
LE: loop exit
PB: predicated region body
PF: predicated region fallthrough
CT: control target
= control target key end

     0   :  { %vm29_vm0 = vcmask 261120   ;;  %s258_s0 = inlined_call_operand.vmem [shape: f32[16,32], index: 0, kind: input, shape index: {}]   ;;  %s259_s1 = inlined_call_operand.vmem [shape: f32[32,128], index: 1, kind: input, shape index: {}]   ;;  %s260_s2 = inlined_call_operand.vmem [shape: f32[1,128], index: 2, kind: input, shape index: {}]   ;;  %s261_s3 = inlined_call_operand.hbm [shape: f32[16,128], index: 3, kind: output, shape index: {}]  }
   0x1   :  { %v23_v0 = vld [vmem:[%s259_s1] sm:$0xff]  ;;  %v24_v1 = vld [vmem:[%s259_s1 + $0x8] sm:$0xff]  ;;  %v25_v2 = vld [vmem:[%s259_s1 + $0x10] sm:$0xff] }
   0x2   :  { %v167_v3 = vpack.c.bf16 %v24_v1, %v23_v0  ;;  %v26_v4 = vld [vmem:[%s259_s1 + $0x18] sm:$0xff]  ;;  %v21_v5 = vld [vmem:[%s258_s0] sm:$0xff] }
   0x3   :  { %v171_v6 = vpack.c.bf16 %v26_v4, %v25_v2  ;;  %164 = vmatprep.mubr.msk.f32.mxu0 %vm29_vm0, %v21_v5 }
   0x4   :  { %8 = vsyncpa [#allocation4], 0  ;;  %168 = vmatprep.subr.bf16.mxu0 %v167_v3  ;;  %v22_v7 = vld [vmem:[%s258_s0 + $0x8] sm:$0xff]  ;;  %v149_v8 = vld [vmem:[%s260_s2] ss:$0 sm:$0xff]  ;;  %s202_s1 = smov [#allocation3]  }
   0x5   :  { %170 = vmatpush3.bf16.msra.mxu0 %v167_v3  ;;  %s136_s26 = sshll.u32 %s202_s1, 4  ;;  %s137_s26 = int_to_ptr.vmem [resolvable:$true] %s136_s26 }
   0x6   :  { %172 = vmatprep.subr.bf16.mxu0 %v171_v6  ;;  %s178_s27 = scalar_lea.vmem %s137_s26, 256  ;;  %p183_p1 = scmp.lt.s32.totalorder %s137_s26, %s137_s26 }
   0x7   :  { %p179_p0 = scmp.ne.s32.totalorder %s137_s26, %s178_s27  ;;  %p184_p2 = scmp.lt.s32.totalorder %s178_s27, %s178_s27 }
   0x9   :  { %174 = vmatpush3.bf16.msra.mxu0 %v171_v6  ;;  %p185_p3 = por %p184_p2, %p183_p1 }
   0xb   :  { %p186_p4 = pnand %p185_p3, %p179_p0 }
   0xc   :  { %165 = vmatmul.mubr.msk.f32.vlgmr.msra.gmra.mrb[0].mxu0 %vm29_vm0, %v22_v7 }
  0xdf   :  { %v166_v9 = vpop.f32.mrb[0].mxu0 }
  0xe0   :  { %v128_v10 = vadd.f32 %v166_v9, %v149_v8  ;;  %v102_v11 = vpop.f32.mrb[1].mxu0 }
  0xe1   :  { %v127_v12 = vadd.f32 %v149_v8, %v102_v11 }
  0xe2   :  { %130 = vst [vmem:[#allocation3 + $0x8] sm:$0xff] %v128_v10 }
  0xe3   :  { %129 = vst [vmem:[#allocation3] sm:$0xff] %v127_v12 }
  0xe4   :  { %189 = shalt.err (!%p186_p4)
}
  0xe5   :  { %s190_s2 = scalar_lea.hbm %s261_s3, 256 }
  0xe6   :  { %p191_p5 = scmp.ne.s32.totalorder %s261_s3, %s190_s2  ;;  %p194_p6 = scmp.lt.u32.totalorder %s190_s2, %s261_s3 }
  0xe8   :  { %p196_p7 = pnand %p194_p6, %p191_p5 }
  0xea   :  { %199 = shalt.err (!%p196_p7)
}
  0xeb   :  { %s203_s6 = smov 128   ;;  %s204_s7 = smov 8  }
  0xec   :  { %142 = dma.vmem_to_hbm [thread:$0]  %s137_s26, 256, %s261_s3, [#allocation4], %s203_s6, %s203_s6, %s204_s7  }
  0xed   :  { %200 = dma.done.wait [#allocation4], 256  }
  0xee   :  { %201 = vsyncadd [#allocation4], 4294967040 }
  0xef   :  { %146 = vsyncpa [#allocation4], 1 }

// kernel: _lambda_.56
= control target key start
LH: loop header
LB: loop body
LE: loop exit
PB: predicated region body
PF: predicated region fallthrough
CT: control target
= control target key end

     0   :  { %s1037_s9 = smov 0   ;;  %s1126_s0 = inlined_call_operand.vmem [shape: f32[2,8,96], index: 0, kind: input, shape index: {}]   ;;  %s1127_s1 = inlined_call_operand.vmem [shape: f32[8,8], index: 1, kind: input, shape index: {}]   ;;  %s1128_s2 = inlined_call_operand.vmem [shape: f32[2,8,32], index: 2, kind: output, shape index: {}]  }
   0x1 LB: > { %s881_s10 = sadd.s32 4294967295, %s1004_s9   ;;  %p885_p0 = scmp.ge.s32.totalorder %s1004_s9, 1  ;;  %s1004_s9 = sphi %s1037_s9, %s12_s9  }
   0x2   : > { %p111_p1 = scmp.lt.s32.totalorder %s1004_s9, 3 }
   0x4   : > { %p112_p2 = pnand %p885_p0, %p111_p1 }
   0x5   : > { %p131_p3 = scmp.lt.s32.totalorder (!%p112_p2), %s881_s10, 1  ;;  %v1006_v0 = vmov (!%p112_p2), 0.0   ;;  %vm1007_vm0 = vmmov (!%p112_p2), 0   ;;  %s1008_s15 = smov (!%p112_p2), 96   ;;  %vm144_vm1 = vcmask (!%p112_p2), 64512   ;;  %v139_v4 = vld [vmem:[%s1127_s1] sm:$0xff] (!%p112_p2) }
   0x6   : > { %115 = sbr.rel (%p112_p2) target bundleno = 1536 (0x600), region = 28  ;;  %918 = vmatprep.subr.mxu0 (!%p112_p2), %v1006_v0  ;;  %920 = vmatprep.mubr.msk.f32.mxu0 (!%p112_p2), %vm1007_vm0, %v1006_v0  ;;  %s1009_s16 = smov (!%p112_p2), 64   ;;  %vm822_vm2 = vcmask (!%p112_p2), 130048   ;;  %vm824_vm3 = vcmask (!%p112_p2), 195584   ;;  %vm826_vm4 = vcmask (!%p112_p2), 261120  }
   0x7   : > { %923 = vmatprep.subr.mxu1 (!%p112_p2), %v1006_v0  ;;  %925 = vmatprep.mubr.msk.f32.mxu1 (!%p112_p2), %vm1007_vm0, %v1006_v0  ;;  %s1010_s17 = smov (!%p112_p2), 88   ;;  %s1011_s18 = smov (!%p112_p2), 120  }
   0x8   : > { %s1012_s19 = smov (!%p112_p2), 80   ;;  %s1013_s22 = smov (!%p112_p2), 72  }
   0x9   : > { %s1014_s23 = smov (!%p112_p2), 112   ;;  %s1015_s24 = smov (!%p112_p2), 104  }
   0xa   : > { %s1016_s25 = smov (!%p112_p2), 56   ;;  %s1017_s26 = smov (!%p112_p2), 40  }
   0xb   : > { %s1018_s27 = smov (!%p112_p2), 48   ;;  %s1019_s28 = smov (!%p112_p2), 8  }
   0xc   : > { %s1020_s29 = smov (!%p112_p2), 16   ;;  %s1021_s30 = smov (!%p112_p2), 24  }
   0xd   : > { %s1130_s10 = smov (!%p131_p3, %s881_s10), 1 }
   0xe   : > { %s886_s11 = sshll.u32 %s1130_s10, 3 }
   0xf   : > { %s134_s14 = scalar_lea.vmem %s1126_s0, %s886_s11  ;;  %s138_s5 = scalar_lea.vmem %s1128_s2, %s886_s11 }
  0x10   : > { %v1059_v1 = vld [vmem:[%s134_s14] sm:$0xff] }
  0x11   : > { %142 = vrot.lane.b32.xlu0 %v1059_v1, %s1008_s15  ;;  %232 = vrot.lane.b32.xlu1 %v1059_v1, %s1009_s16 }
  0x15   : > { %310 = vrot.lane.b32.xlu1 %v1059_v1, %s1010_s17 }
  0x19   : > { %308 = vrot.lane.b32.xlu1 %v1059_v1, %s1011_s18 }
  0x1d   : > { %477 = vrot.lane.b32.xlu1 %v1059_v1, %s1012_s19 }
  0x83   : > { %v143_v2 = vpop.permute.xlu0 %142  ;;  %v233_v9 = vpop.permute.xlu1 %232 }
  0x84   : > { %919 = vmatpush3.xpose.msk.msra.mxu0 %vm144_vm1, %v143_v2  ;;  %924 = vmatpush3.msra.mxu1 %v233_v9 }
  0x85   : > { %933 = vmatprep.subr.mxu0 %v1006_v0  ;;  %928 = vmatprep.subr.mxu1 %v1006_v0 }
  0x87   : > { %921 = vmatmul.mubr.msk.f32.vlgmr.msra.gmra.mrb[0].mxu0 %vm144_vm1, %v1059_v1  ;;  %v311_v15 = vpop.permute.xlu1 %310 }
  0x88   : > { %935 = vmatprep.mubr.msk.f32.mxu0 %vm1007_vm0, %v1006_v0 }
  0x8b   : > { %v309_v16 = vpop.permute.xlu1 %308 }
  0x8f   : > { %v478_v17 = vpop.permute.xlu1 %477 }
 0x15a   : > { %v215_v3 = vpop.f32.mrb[0].mxu0 }
 0x15b   : > { %v219_v5 = vmul.f32 0.35355338, %v215_v3  ;;  %v922_v6 = vpop.f32.mrb[1].mxu0 }
 0x15d   : > { %v220_v7 = vadd.f32 %v219_v5, %v139_v4 }
 0x15f   : > { %v221_v8 = vsel %vm144_vm1, %v220_v7, -inf }
 0x160   : > { %222 = vmax.xlane.f32.xlu0 %v221_v8 }
 0x176   : > { %644 = vrot.lane.b32.xlu0 %v1059_v1, %s1013_s22 }
 0x1ed   : > { %v223_v10 = vpop.xlane.xlu0 %222 }
 0x1ee   : > { %v224_v11 = vsub.f32 %v220_v7, %v223_v10 }
 0x1f0   : > { %v225_v12 = vmul.f32 1.442695, %v224_v11 }
 0x1f1   : > { %v645_v22 = vpop.permute.xlu0 %644 }
 0x1f2   : > { %982 = vpow2.f32 %v225_v12 }
 0x1fc   : > { %v983_v13 = vpop.eup %982 }
 0x1fd   : > { %v227_v14 = vsel %vm144_vm1, %v983_v13, 0.0 }
 0x1fe   : > { %228 = vadd.xlane.f32.xlu1 %v227_v14 }
 0x20f   : > { %475 = vrot.lane.b32.xlu1 %v1059_v1, %s1014_s23 }
 0x213   : > { %642 = vrot.lane.b32.xlu1 %v1059_v1, %s1015_s24 }
 0x28b   : > { %v229_v18 = vpop.xlane.xlu1 %228 }
 0x28c   : > { %984 = vrcp.f32 %v229_v18 }
 0x28f   : > { %v476_v21 = vpop.permute.xlu1 %475 }
 0x293   : > { %v643_v23 = vpop.permute.xlu1 %642 }
 0x296   : > { %v985_v19 = vpop.eup %984 }
 0x297   : > { %v231_v20 = vmul.f32 %v985_v19, %v983_v13 }
 0x299   : > { %926 = vmatmul.mubr.msk.f32.vlgmr.msra.gmra.mrb[0].mxu1 %vm144_vm1, %v231_v20 }
 0x29a   : > { %929 = vmatpush3.xpose.msk.msra.mxu1 %vm144_vm1, %v311_v15  ;;  %930 = vmatprep.mubr.msk.f32.mxu1 %vm1007_vm0, %v1006_v0 }
 0x29b   : > { %938 = vmatprep.subr.mxu1 %v1006_v0 }
 0x29d   : > { %931 = vmatmul.mubr.msk.f32.vlgmr.msra.gmra.mrb[2].mxu1 %vm144_vm1, %v309_v16 }
 0x29e   : > { %939 = vmatpush3.xpose.msk.msra.mxu1 %vm144_vm1, %v478_v17  ;;  %940 = vmatprep.mubr.msk.f32.mxu1 %vm1007_vm0, %v1006_v0 }
 0x29f   : > { %948 = vmatprep.subr.mxu1 %v1006_v0 }
 0x2a1   : > { %941 = vmatmul.mubr.msk.f32.vlgmr.msra.gmra.mrb[4].mxu1 %vm144_vm1, %v476_v21 }
 0x2a2   : > { %949 = vmatpush3.xpose.msk.msra.mxu1 %vm144_vm1, %v645_v22  ;;  %950 = vmatprep.mubr.msk.f32.mxu1 %vm1007_vm0, %v1006_v0 }
 0x2a5   : > { %951 = vmatmul.mubr.msk.f32.vlgmr.msra.gmra.mrb[6].mxu1 %vm144_vm1, %v643_v23 }
 0x36c   : > { %v1096_v24 = vpop.f32.mrb[0].mxu1 }
 0x36d   : > { %v927_v25 = vpop.f32.mrb[1].mxu1 }
 0x370   : > { %v382_v26 = vpop.f32.mrb[2].mxu1 }
 0x371   : > { %v386_v27 = vmul.f32 0.35355338, %v382_v26  ;;  %v932_v28 = vpop.f32.mrb[3].mxu1 }
 0x373   : > { %v387_v29 = vadd.f32 %v386_v27, %v139_v4 }
 0x374   : > { %v549_v30 = vpop.f32.mrb[4].mxu1 }
 0x375   : > { %v553_v31 = vmul.f32 0.35355338, %v549_v30  ;;  %v942_v32 = vpop.f32.mrb[5].mxu1  ;;  %v388_v33 = vsel %vm144_vm1, %v387_v29, -inf }
 0x376   : > { %389 = vmax.xlane.f32.xlu1 %v388_v33 }
 0x377   : > { %v554_v34 = vadd.f32 %v553_v31, %v139_v4 }
 0x378   : > { %v716_v35 = vpop.f32.mrb[6].mxu1 }
 0x379   : > { %v720_v36 = vmul.f32 0.35355338, %v716_v35  ;;  %v952_v37 = vpop.f32.mrb[7].mxu1  ;;  %v555_v38 = vsel %vm144_vm1, %v554_v34, -inf }
 0x37a   : > { %556 = vmax.xlane.f32.xlu0 %v555_v38 }
 0x37b   : > { %v721_v39 = vadd.f32 %v720_v36, %v139_v4 }
 0x37d   : > { %v722_v40 = vsel %vm144_vm1, %v721_v39, -inf }
 0x37e   : > { %723 = vmax.xlane.f32.xlu1 %v722_v40 }
 0x38f   : > { %399 = vrot.lane.b32.xlu1 %v1059_v1, %s1016_s25 }
 0x403   : > { %v390_v41 = vpop.xlane.xlu1 %389 }
 0x404   : > { %v391_v42 = vsub.f32 %v387_v29, %v390_v41 }
 0x406   : > { %v392_v43 = vmul.f32 1.442695, %v391_v42 }
 0x407   : > { %v557_v44 = vpop.xlane.xlu0 %556 }
 0x408   : > { %986 = vpow2.f32 %v392_v43  ;;  %v558_v45 = vsub.f32 %v554_v34, %v557_v44 }
 0x40a   : > { %v559_v46 = vmul.f32 1.442695, %v558_v45 }
 0x40b   : > { %v724_v47 = vpop.xlane.xlu1 %723 }
 0x40c   : > { %988 = vpow2.f32 %v559_v46  ;;  %v725_v48 = vsub.f32 %v721_v39, %v724_v47 }
 0x40e   : > { %v726_v49 = vmul.f32 1.442695, %v725_v48 }
 0x40f   : > { %v400_v50 = vpop.permute.xlu1 %399 }
 0x410   : > { %990 = vpow2.f32 %v726_v49  ;;  %934 = vmatpush3.msra.mxu0 %v400_v50 }
 0x411   : > { %943 = vmatprep.subr.mxu0 %v1006_v0 }
 0x412   : > { %v987_v51 = vpop.eup %986 }
 0x413   : > { %v394_v52 = vsel %vm144_vm1, %v987_v51, 0.0 }
 0x414   : > { %395 = vadd.xlane.f32.xlu1 %v394_v52 }
 0x416   : > { %v989_v53 = vpop.eup %988 }
 0x417   : > { %v561_v54 = vsel %vm144_vm1, %v989_v53, 0.0 }
 0x418   : > { %562 = vadd.xlane.f32.xlu1 %v561_v54 }
 0x41a   : > { %v991_v55 = vpop.eup %990 }
 0x41b   : > { %v728_v56 = vsel %vm144_vm1, %v991_v55, 0.0 }
 0x41c   : > { %729 = vadd.xlane.f32.xlu0 %v728_v56 }
 0x429   : > { %733 = vrot.lane.b32.xlu1 %v1059_v1, %s1017_s26 }
 0x432   : > { %566 = vrot.lane.b32.xlu0 %v1059_v1, %s1018_s27 }
 0x4a1   : > { %v396_v57 = vpop.xlane.xlu1 %395 }
 0x4a2   : > { %992 = vrcp.f32 %v396_v57 }
 0x4a5   : > { %v563_v58 = vpop.xlane.xlu1 %562 }
 0x4a6   : > { %994 = vrcp.f32 %v563_v58 }
 0x4a9   : > { %v730_v59 = vpop.xlane.xlu0 %729  ;;  %v734_v3 = vpop.permute.xlu1 %733 }
 0x4aa   : > { %996 = vrcp.f32 %v730_v59 }
 0x4ac   : > { %v993_v60 = vpop.eup %992 }
 0x4ad   : > { %v398_v61 = vmul.f32 %v993_v60, %v987_v51  ;;  %v567_v62 = vpop.permute.xlu0 %566 }
 0x4af   : > { %936 = vmatmul.mubr.msk.f32.vlgmr.msra.gmra.mrb[2].mxu0 %vm144_vm1, %v398_v61 }
 0x4b0   : > { %v995_v63 = vpop.eup %994  ;;  %944 = vmatpush3.msra.mxu0 %v567_v62  ;;  %945 = vmatprep.mubr.msk.f32.mxu0 %vm1007_vm0, %v1006_v0 }
 0x4b1   : > { %v565_v2 = vmul.f32 %v995_v63, %v989_v53  ;;  %953 = vmatprep.subr.mxu0 %v1006_v0 }
 0x4b3   : > { %946 = vmatmul.mubr.msk.f32.vlgmr.msra.gmra.mrb[4].mxu0 %vm144_vm1, %v565_v2 }
 0x4b4   : > { %v997_v1 = vpop.eup %996  ;;  %954 = vmatpush3.msra.mxu0 %v734_v3  ;;  %955 = vmatprep.mubr.msk.f32.mxu0 %vm1007_vm0, %v1006_v0 }
 0x4b5   : > { %v732_v4 = vmul.f32 %v997_v1, %v991_v55 }
 0x4b7   : > { %956 = vmatmul.mubr.msk.f32.vlgmr.msra.gmra.mrb[6].mxu0 %vm144_vm1, %v732_v4 }
 0x582   : > { %v471_v5 = vpop.f32.mrb[2].mxu0 }
 0x583   : > { %810 = vrot.lane.b32.xlu1 %v471_v5, %s1019_s28  ;;  %v937_v6 = vpop.f32.mrb[3].mxu0 }
 0x586   : > { %v638_v7 = vpop.f32.mrb[4].mxu0 }
 0x587   : > { %814 = vrot.lane.b32.xlu0 %v638_v7, %s1020_s29  ;;  %v947_v8 = vpop.f32.mrb[5].mxu0 }
 0x58a   : > { %v805_v9 = vpop.f32.mrb[6].mxu0 }
 0x58b   : > { %818 = vrot.lane.b32.xlu1 %v805_v9, %s1021_s30  ;;  %v957_v10 = vpop.f32.mrb[7].mxu0 }
 0x5f5   : > { %v811_v11 = vpop.permute.xlu1 %810 }
 0x5f6   : > { %v821_v0 = vsel %vm144_vm1, %v1096_v24, %v811_v11 }
 0x5f9   : > { %v815_v12 = vpop.permute.xlu0 %814 }
 0x5fa   : > { %v823_v13 = vsel %vm822_vm2, %v821_v0, %v815_v12 }
 0x5fd   : > { %v819_v14 = vpop.permute.xlu1 %818 }
 0x5fe   : > { %v825_v15 = vsel %vm824_vm3, %v823_v13, %v819_v14 }
 0x5ff   : > { %827 = vst.msk [vmem:[%s138_s5] sm:$0xff] %vm826_vm4, %v825_v15 }
 0x600 PF: > { %s12_s9 = sadd.s32 1, %s1004_s9  }
 0x601   : > { %p9_p4 = scmp.ge.s32.totalorder %s12_s9, 4  }
 0x603   :  { %11 = sbr.rel (!%p9_p4) target bundleno = 1 (0x1), region = 58 }

// kernel: _lambda_.61
= control target key start
LH: loop header
LB: loop body
LE: loop exit
PB: predicated region body
PF: predicated region fallthrough
CT: control target
= control target key end

     0   :  { %s1054_s9 = smov 0   ;;  %s1137_s0 = inlined_call_operand.vmem [shape: f32[2,8,32], index: 0, kind: input, shape index: {}]   ;;  %s1138_s1 = inlined_call_operand.vmem [shape: f32[2,8,64], index: 1, kind: input, shape index: {}]   ;;  %s1139_s2 = inlined_call_operand.vmem [shape: f32[2,8,32], index: 2, kind: output, shape index: {}]  }
   0x1 LB: > { %s905_s10 = sadd.s32 4294967295, %s1025_s9   ;;  %p909_p0 = scmp.ge.s32.totalorder %s1025_s9, 1  ;;  %s1025_s9 = sphi %s1054_s9, %s12_s9  }
   0x2   : > { %p120_p1 = scmp.lt.s32.totalorder %s1025_s9, 3 }
   0x4   : > { %p121_p2 = pnand %p909_p0, %p120_p1 }
   0x5   : > { %p144_p3 = scmp.lt.s32.totalorder (!%p121_p2), %s905_s10, 1  ;;  %v1027_v0 = vmov (!%p121_p2), 0.0   ;;  %vm1028_vm0 = vmmov (!%p121_p2), 0   ;;  %vm158_vm1 = vcmask (!%p121_p2), 64512   ;;  %s1029_s18 = smov (!%p121_p2), 96   ;;  %vm834_vm2 = vcmask (!%p121_p2), 130048  }
   0x6   : > { %124 = sbr.rel (%p121_p2) target bundleno = 1417 (0x589), region = 28  ;;  %943 = vmatprep.subr.mxu0 (!%p121_p2), %v1027_v0  ;;  %945 = vmatprep.mubr.msk.f32.mxu0 (!%p121_p2), %vm1028_vm0, %v1027_v0  ;;  %s1030_s19 = smov (!%p121_p2), 120   ;;  %vm836_vm3 = vcmask (!%p121_p2), 195584   ;;  %vm838_vm4 = vcmask (!%p121_p2), 261120  }
   0x7   : > { %948 = vmatprep.subr.mxu1 (!%p121_p2), %v1027_v0  ;;  %950 = vmatprep.mubr.msk.f32.mxu1 (!%p121_p2), %vm1028_vm0, %v1027_v0  ;;  %s1031_s20 = smov (!%p121_p2), 112   ;;  %s1032_s21 = smov (!%p121_p2), 104  }
   0x8   : > { %s1033_s22 = smov (!%p121_p2), 88   ;;  %s1034_s23 = smov (!%p121_p2), 72  }
   0x9   : > { %s1035_s24 = smov (!%p121_p2), 80   ;;  %s1036_s25 = smov (!%p121_p2), 8  }
   0xa   : > { %s1037_s26 = smov (!%p121_p2), 16   ;;  %s1038_s27 = smov (!%p121_p2), 24  }
   0xd   : > { %s1141_s10 = smov (!%p144_p3, %s905_s10), 1 }
   0xe   : > { %s1068_s11 = sshll.u32 %s1141_s10, 3 }
   0xf   : > { %s151_s14 = scalar_lea.vmem %s1138_s1, %s1068_s11  ;;  %s147_s17 = scalar_lea.vmem %s1137_s0, %s1068_s11 }
  0x10   : > { %v1078_v1 = vld [vmem:[%s151_s14] sm:$0xff]  ;;  %s155_s30 = scalar_lea.vmem %s1139_s2, %s1068_s11 }
  0x11   : > { %944 = vmatpush3.xpose.msk.msra.mxu0 %vm158_vm1, %v1078_v1  ;;  %v156_v2 = vld [vmem:[%s147_s17] sm:$0xff]  ;;  %247 = vrot.lane.b32.xlu1 %v1078_v1, %s1029_s18 }
  0x12   : > { %958 = vmatprep.subr.mxu0 %v1027_v0 }
  0x14   : > { %946 = vmatmul.mubr.msk.f32.vlgmr.msra.gmra.mrb[0].mxu0 %vm158_vm1, %v156_v2 }
  0x15   : > { %960 = vmatprep.mubr.msk.f32.mxu0 %vm1028_vm0, %v1027_v0  ;;  %325 = vrot.lane.b32.xlu1 %v1078_v1, %s1030_s19 }
  0x19   : > { %491 = vrot.lane.b32.xlu1 %v1078_v1, %s1031_s20 }
  0x1d   : > { %489 = vrot.lane.b32.xlu1 %v156_v2, %s1031_s20 }
  0x21   : > { %657 = vrot.lane.b32.xlu1 %v1078_v1, %s1032_s21 }
  0x25   : > { %655 = vrot.lane.b32.xlu1 %v156_v2, %s1032_s21 }
  0x83   : > { %v248_v12 = vpop.permute.xlu1 %247 }
  0x84   : > { %949 = vmatpush3.msra.mxu1 %v248_v12 }
  0x85   : > { %953 = vmatprep.subr.mxu1 %v1027_v0 }
  0x87   : > { %v326_v13 = vpop.permute.xlu1 %325 }
  0x8b   : > { %v492_v15 = vpop.permute.xlu1 %491 }
  0x8f   : > { %v490_v17 = vpop.permute.xlu1 %489 }
  0x93   : > { %v658_v20 = vpop.permute.xlu1 %657 }
  0x97   : > { %v656_v21 = vpop.permute.xlu1 %655 }
  0xe7   : > { %v231_v3 = vpop.f32.mrb[0].mxu0 }
  0xe8   : > { %v235_v4 = vmul.f32 0.35355338, %v231_v3  ;;  %v947_v5 = vpop.f32.mrb[1].mxu0 }
  0xea   : > { %v236_v6 = vsel %vm158_vm1, %v235_v4, -inf }
  0xeb   : > { %237 = vmax.xlane.f32.xlu0 %v236_v6 }
 0x178   : > { %v238_v7 = vpop.xlane.xlu0 %237 }
 0x179   : > { %v239_v8 = vsub.f32 %v235_v4, %v238_v7 }
 0x17b   : > { %v240_v9 = vmul.f32 1.442695, %v239_v8 }
 0x17d   : > { %1003 = vpow2.f32 %v240_v9 }
 0x187   : > { %v1004_v10 = vpop.eup %1003 }
 0x188   : > { %v242_v11 = vsel %vm158_vm1, %v1004_v10, 0.0 }
 0x189   : > { %243 = vadd.xlane.f32.xlu0 %v242_v11 }
 0x19f   : > { %323 = vrot.lane.b32.xlu0 %v156_v2, %s1030_s19 }
 0x216   : > { %v244_v14 = vpop.xlane.xlu0 %243 }
 0x217   : > { %1005 = vrcp.f32 %v244_v14 }
 0x21a   : > { %v324_v19 = vpop.permute.xlu0 %323 }
 0x221   : > { %v1006_v16 = vpop.eup %1005 }
 0x222   : > { %v246_v18 = vmul.f32 %v1006_v16, %v1004_v10 }
 0x224   : > { %951 = vmatmul.mubr.msk.f32.vlgmr.msra.gmra.mrb[0].mxu1 %vm158_vm1, %v246_v18 }
 0x225   : > { %954 = vmatpush3.xpose.msk.msra.mxu1 %vm158_vm1, %v326_v13  ;;  %955 = vmatprep.mubr.msk.f32.mxu1 %vm1028_vm0, %v1027_v0 }
 0x226   : > { %963 = vmatprep.subr.mxu1 %v1027_v0 }
 0x228   : > { %956 = vmatmul.mubr.msk.f32.vlgmr.msra.gmra.mrb[2].mxu1 %vm158_vm1, %v324_v19 }
 0x229   : > { %964 = vmatpush3.xpose.msk.msra.mxu1 %vm158_vm1, %v492_v15  ;;  %965 = vmatprep.mubr.msk.f32.mxu1 %vm1028_vm0, %v1027_v0 }
 0x22a   : > { %973 = vmatprep.subr.mxu1 %v1027_v0 }
 0x22c   : > { %966 = vmatmul.mubr.msk.f32.vlgmr.msra.gmra.mrb[4].mxu1 %vm158_vm1, %v490_v17 }
 0x22d   : > { %974 = vmatpush3.xpose.msk.msra.mxu1 %vm158_vm1, %v658_v20  ;;  %975 = vmatprep.mubr.msk.f32.mxu1 %vm1028_vm0, %v1027_v0 }
 0x230   : > { %976 = vmatmul.mubr.msk.f32.vlgmr.msra.gmra.mrb[6].mxu1 %vm158_vm1, %v656_v21 }
 0x2f7   : > { %v1108_v22 = vpop.f32.mrb[0].mxu1 }
 0x2f8   : > { %v952_v23 = vpop.f32.mrb[1].mxu1 }
 0x2fb   : > { %v397_v24 = vpop.f32.mrb[2].mxu1 }
 0x2fc   : > { %v401_v25 = vmul.f32 0.35355338, %v397_v24  ;;  %v957_v26 = vpop.f32.mrb[3].mxu1 }
 0x2fe   : > { %v402_v27 = vsel %vm158_vm1, %v401_v25, -inf }
 0x2ff   : > { %403 = vmax.xlane.f32.xlu1 %v402_v27  ;;  %v563_v28 = vpop.f32.mrb[4].mxu1 }
 0x300   : > { %v567_v29 = vmul.f32 0.35355338, %v563_v28  ;;  %v967_v30 = vpop.f32.mrb[5].mxu1 }
 0x302   : > { %v568_v31 = vsel %vm158_vm1, %v567_v29, -inf }
 0x303   : > { %569 = vmax.xlane.f32.xlu0 %v568_v31  ;;  %v729_v32 = vpop.f32.mrb[6].mxu1 }
 0x304   : > { %v733_v33 = vmul.f32 0.35355338, %v729_v32  ;;  %v977_v34 = vpop.f32.mrb[7].mxu1 }
 0x306   : > { %v734_v35 = vsel %vm158_vm1, %v733_v33, -inf }
 0x307   : > { %735 = vmax.xlane.f32.xlu1 %v734_v35 }
 0x318   : > { %413 = vrot.lane.b32.xlu1 %v1078_v1, %s1033_s22 }
 0x38c   : > { %v404_v36 = vpop.xlane.xlu1 %403 }
 0x38d   : > { %v405_v37 = vsub.f32 %v401_v25, %v404_v36 }
 0x38f   : > { %v406_v38 = vmul.f32 1.442695, %v405_v37 }
 0x390   : > { %v570_v39 = vpop.xlane.xlu0 %569 }
 0x391   : > { %1007 = vpow2.f32 %v406_v38  ;;  %v571_v40 = vsub.f32 %v567_v29, %v570_v39 }
 0x393   : > { %v572_v41 = vmul.f32 1.442695, %v571_v40 }
 0x394   : > { %v736_v42 = vpop.xlane.xlu1 %735 }
 0x395   : > { %1009 = vpow2.f32 %v572_v41  ;;  %v737_v43 = vsub.f32 %v733_v33, %v736_v42 }
 0x397   : > { %v738_v44 = vmul.f32 1.442695, %v737_v43 }
 0x398   : > { %v414_v45 = vpop.permute.xlu1 %413 }
 0x399   : > { %1011 = vpow2.f32 %v738_v44  ;;  %959 = vmatpush3.msra.mxu0 %v414_v45 }
 0x39a   : > { %968 = vmatprep.subr.mxu0 %v1027_v0 }
 0x39b   : > { %v1008_v46 = vpop.eup %1007 }
 0x39c   : > { %v408_v47 = vsel %vm158_vm1, %v1008_v46, 0.0 }
 0x39d   : > { %409 = vadd.xlane.f32.xlu0 %v408_v47 }
 0x39f   : > { %v1010_v48 = vpop.eup %1009 }
 0x3a0   : > { %v574_v49 = vsel %vm158_vm1, %v1010_v48, 0.0 }
 0x3a1   : > { %575 = vadd.xlane.f32.xlu1 %v574_v49 }
 0x3a3   : > { %v1012_v50 = vpop.eup %1011 }
 0x3a4   : > { %v740_v51 = vsel %vm158_vm1, %v1012_v50, 0.0 }
 0x3a5   : > { %741 = vadd.xlane.f32.xlu0 %v740_v51 }
 0x3b2   : > { %745 = vrot.lane.b32.xlu1 %v1078_v1, %s1034_s23 }
 0x3bb   : > { %579 = vrot.lane.b32.xlu0 %v1078_v1, %s1035_s24 }
 0x42a   : > { %v410_v52 = vpop.xlane.xlu0 %409 }
 0x42b   : > { %1013 = vrcp.f32 %v410_v52 }
 0x42e   : > { %v576_v53 = vpop.xlane.xlu1 %575 }
 0x42f   : > { %1015 = vrcp.f32 %v576_v53 }
 0x432   : > { %v742_v54 = vpop.xlane.xlu0 %741  ;;  %v746_v60 = vpop.permute.xlu1 %745 }
 0x433   : > { %1017 = vrcp.f32 %v742_v54 }
 0x435   : > { %v1014_v55 = vpop.eup %1013 }
 0x436   : > { %v412_v56 = vmul.f32 %v1014_v55, %v1008_v46  ;;  %v580_v57 = vpop.permute.xlu0 %579 }
 0x438   : > { %961 = vmatmul.mubr.msk.f32.vlgmr.msra.gmra.mrb[2].mxu0 %vm158_vm1, %v412_v56 }
 0x439   : > { %v1016_v58 = vpop.eup %1015  ;;  %969 = vmatpush3.msra.mxu0 %v580_v57  ;;  %970 = vmatprep.mubr.msk.f32.mxu0 %vm1028_vm0, %v1027_v0 }
 0x43a   : > { %v578_v59 = vmul.f32 %v1016_v58, %v1010_v48  ;;  %978 = vmatprep.subr.mxu0 %v1027_v0 }
 0x43c   : > { %971 = vmatmul.mubr.msk.f32.vlgmr.msra.gmra.mrb[4].mxu0 %vm158_vm1, %v578_v59 }
 0x43d   : > { %v1018_v61 = vpop.eup %1017  ;;  %979 = vmatpush3.msra.mxu0 %v746_v60  ;;  %980 = vmatprep.mubr.msk.f32.mxu0 %vm1028_vm0, %v1027_v0 }
 0x43e   : > { %v744_v62 = vmul.f32 %v1018_v61, %v1012_v50 }
 0x440   : > { %981 = vmatmul.mubr.msk.f32.vlgmr.msra.gmra.mrb[6].mxu0 %vm158_vm1, %v744_v62 }
 0x50b   : > { %v485_v63 = vpop.f32.mrb[2].mxu0 }
 0x50c   : > { %822 = vrot.lane.b32.xlu1 %v485_v63, %s1036_s25  ;;  %v962_v1 = vpop.f32.mrb[3].mxu0 }
 0x50f   : > { %v651_v2 = vpop.f32.mrb[4].mxu0 }
 0x510   : > { %826 = vrot.lane.b32.xlu0 %v651_v2, %s1037_s26  ;;  %v972_v3 = vpop.f32.mrb[5].mxu0 }
 0x513   : > { %v817_v4 = vpop.f32.mrb[6].mxu0 }
 0x514   : > { %830 = vrot.lane.b32.xlu1 %v817_v4, %s1038_s27  ;;  %v982_v5 = vpop.f32.mrb[7].mxu0 }
 0x57e   : > { %v823_v6 = vpop.permute.xlu1 %822 }
 0x57f   : > { %v833_v0 = vsel %vm158_vm1, %v1108_v22, %v823_v6 }
 0x582   : > { %v827_v7 = vpop.permute.xlu0 %826 }
 0x583   : > { %v835_v8 = vsel %vm834_vm2, %v833_v0, %v827_v7 }
 0x586   : > { %v831_v9 = vpop.permute.xlu1 %830 }
 0x587   : > { %v837_v10 = vsel %vm836_vm3, %v835_v8, %v831_v9 }
 0x588   : > { %839 = vst.msk [vmem:[%s155_s30] sm:$0xff] %vm838_vm4, %v837_v10 }
 0x589 PF: > { %s12_s9 = sadd.s32 1, %s1025_s9  }
 0x58a   : > { %p9_p4 = scmp.ge.s32.totalorder %s12_s9, 4  }
 0x58c   :  { %11 = sbr.rel (!%p9_p4) target bundleno = 1 (0x1), region = 61 }

</bundles_post_ra>
